<compile_context>
chip_gen: v5e
topology: v5e:2x2
jax: 0.10.0
libtpu: 0.0.40
codegen_flags: <defaults>
</compile_context>

<pallas_src>
import functools

import jax
import jax.numpy as jnp
from jax.experimental import pallas as pl
from jax.experimental.pallas import tpu as pltpu

_NEG = -1.0e30   # pad value for the vocab lane dim (exp underflows to 0, never the max)
_TB = 128        # tokens per grid step
_LANE = 128      # padding multiple for vocab dims


def _round_up(x, m):
    return ((x + m - 1) // m) * m


def _gather_rows(idx_col, table, tb, vr):
    """logits[t, :] = table[idx[t], :] via one-hot x table on the MXU.

    The one-hot entries are exactly representable, so with HIGHEST precision the
    f32 selection is exact to f32 rounding.
    """
    onehot = (idx_col == jax.lax.broadcasted_iota(jnp.int32, (tb, vr), 1)).astype(
        jnp.float32)                                   # (TB, Vr)
    return jax.lax.dot_general(
        onehot, table,
        dimension_numbers=(((1,), (0,)), ((), ())),
        precision=jax.lax.Precision.HIGHEST,
        preferred_element_type=jnp.float32)            # (TB, Vp)


def _bigram_loss_kernel(idx_ref, tgt_ref, table_ref, logits_ref, loss_ref):
    """One grid step == TB tokens. Emits logits tile + per-token CE loss column."""
    tb = idx_ref.shape[0]
    vr, vp = table_ref.shape

    logits = _gather_rows(idx_ref[...], table_ref[...], tb, vr)   # (TB, Vp)
    logits_ref[...] = logits

    # Cross-entropy per token: logsumexp(row) - row[target]   (computed once per tile)
    m = jnp.max(logits, axis=-1, keepdims=True)                                # (TB, 1)
    lse = m + jnp.log(jnp.sum(jnp.exp(logits - m), axis=-1, keepdims=True))    # (TB, 1)
    col = jax.lax.broadcasted_iota(jnp.int32, (tb, vp), 1)
    tgt_logit = jnp.sum(jnp.where(col == tgt_ref[...], logits, 0.0),
                        axis=-1, keepdims=True)                                # (TB, 1)
    loss_ref[...] = lse - tgt_logit


def _bigram_logits_kernel(idx_ref, table_ref, logits_ref):
    # Inference path: pure batched embedding-row gather, no softmax / loss work.
    tb = idx_ref.shape[0]
    vr, _ = table_ref.shape
    logits_ref[...] = _gather_rows(idx_ref[...], table_ref[...], tb, vr)


@functools.partial(jax.jit, static_argnames=("v",))
def _bigram_with_loss(idx2d, tgt2d, w, *, v):
    n = idx2d.shape[0]
    vr, vp = w.shape
    n_pad = _round_up(n, _TB)
    idx_p = jnp.pad(idx2d, ((0, n_pad - n), (0, 0)))   # padded tokens gather row 0 (harmless)
    tgt_p = jnp.pad(tgt2d, ((0, n_pad - n), (0, 0)))
    num_tiles = n_pad // _TB

    logits_p, per_tok = pl.pallas_call(
        _bigram_loss_kernel,
        out_shape=(
            jax.ShapeDtypeStruct((n_pad, vp), jnp.float32),
            jax.ShapeDtypeStruct((n_pad, 1), jnp.float32),
        ),
        grid=(num_tiles,),
        in_specs=[
            pl.BlockSpec((_TB, 1), lambda i: (i, 0)),
            pl.BlockSpec((_TB, 1), lambda i: (i, 0)),
            pl.BlockSpec((vr, vp), lambda i: (0, 0)),   # resident table, DMA'd once
        ],
        out_specs=(
            pl.BlockSpec((_TB, vp), lambda i: (i, 0)),
            pl.BlockSpec((_TB, 1), lambda i: (i, 0)),
        ),
        compiler_params=pltpu.CompilerParams(
            dimension_semantics=("parallel",)),         # tiles independent (v7x 2-TC shard)
        cost_estimate=pl.CostEstimate(
            flops=2 * n_pad * vr * vp,
            transcendentals=n_pad * vp,
            bytes_accessed=n_pad * vp * 4 + vr * vp * 4 + 3 * n_pad * 4),
    )(idx_p, tgt_p, w)

    # Final mean reduction over the valid tokens (tree reduce in XLA, not a serial
    # in-kernel accumulator).  Slices keep the original PyTorch (B*T, V) semantics.
    loss = jnp.sum(per_tok[:n, 0]) / n
    return logits_p[:n, :v], loss


@functools.partial(jax.jit, static_argnames=("v",))
def _bigram_logits_only(idx2d, w, *, v):
    n = idx2d.shape[0]
    vr, vp = w.shape
    n_pad = _round_up(n, _TB)
    idx_p = jnp.pad(idx2d, ((0, n_pad - n), (0, 0)))
    num_tiles = n_pad // _TB

    logits_p = pl.pallas_call(
        _bigram_logits_kernel,
        out_shape=jax.ShapeDtypeStruct((n_pad, vp), jnp.float32),
        grid=(num_tiles,),
        in_specs=[
            pl.BlockSpec((_TB, 1), lambda i: (i, 0)),
            pl.BlockSpec((vr, vp), lambda i: (0, 0)),
        ],
        out_specs=pl.BlockSpec((_TB, vp), lambda i: (i, 0)),
        compiler_params=pltpu.CompilerParams(
            dimension_semantics=("parallel",)),
        cost_estimate=pl.CostEstimate(
            flops=2 * n_pad * vr * vp,
            transcendentals=0,
            bytes_accessed=n_pad * vp * 4 + vr * vp * 4 + n_pad * 4),
    )(idx_p, w)
    return logits_p[:n, :v]


class BigramLanguageModel:
    """Mirrors the PyTorch BigramLanguageModel forward pass."""

    def __init__(self, emb_table):
        emb_table = jnp.asarray(emb_table, jnp.float32)
        v = emb_table.shape[0]
        assert emb_table.shape == (v, v)
        self.vocab_size = v
        vp = _round_up(v, _LANE)   # logit (lane) dim
        vr = _round_up(v, _LANE)   # token-id (row) dim
        # Pad ONCE at construction (not per forward):
        #   lane dim -> -1e30 so padded vocab columns never win max / vanish in exp
        #   row dim  -> 0.0, never selected by the one-hot gather
        w = jnp.pad(emb_table, ((0, 0), (0, vp - v)), constant_values=_NEG)
        w = jnp.pad(w, ((0, vr - v), (0, 0)), constant_values=0.0)
        self.w_padded = w

    def __call__(self, idx, targets=None):
        return self.forward(idx, targets)

    def forward(self, idx, targets=None):
        """Returns (logits, loss):
          - targets is None : logits (B, T, V), loss None
          - targets given   : logits (B*T, V), loss scalar (mean cross-entropy)
        """
        B, T = idx.shape
        v = self.vocab_size
        idx2d = idx.reshape(-1, 1).astype(jnp.int32)
        if targets is None:
            logits = _bigram_logits_only(idx2d, self.w_padded, v=v)
            return logits.reshape(B, T, v), None
        tgt2d = targets.reshape(-1, 1).astype(jnp.int32)
        return _bigram_with_loss(idx2d, tgt2d, self.w_padded, v=v)

    # TODO(synk): generate() (autoregressive multinomial sampling loop) is a
    # host-side control loop around forward(); not a kernel, so not translated here.


if __name__ == "__main__":
    vocab_size = 65   # e.g. tiny-shakespeare character vocab
    B, T = 2, 8

    key = jax.random.PRNGKey(0)
    k_emb, k_idx, k_tgt = jax.random.split(key, 3)

    # nn.Embedding default init: N(0, 1)
    emb_table = jax.random.normal(k_emb, (vocab_size, vocab_size), jnp.float32)
    idx = jax.random.randint(k_idx, (B, T), 0, vocab_size, jnp.int32)
    targets = jax.random.randint(k_tgt, (B, T), 0, vocab_size, jnp.int32)

    model = BigramLanguageModel(emb_table)

    # Path with targets (logits reshaped to (B*T, V), scalar loss)
    logits, loss = model(idx, targets)
    jax.block_until_ready((logits, loss))

    # Path without targets (logits (B, T, V), loss None)
    logits_nt, loss_nt = model(idx, None)
    jax.block_until_ready(logits_nt)

    # Reference check in plain JAX
    ref_logits = emb_table[idx.reshape(-1)]
    ref_lse = jax.scipy.special.logsumexp(ref_logits, axis=-1)
    ref_loss = jnp.mean(
        ref_lse - ref_logits[jnp.arange(B * T), targets.reshape(-1)]
    )
    assert logits.shape == (B * T, vocab_size)
    assert jnp.allclose(logits, ref_logits, atol=1e-5)
    assert jnp.allclose(loss, ref_loss, atol=1e-5)
    assert logits_nt.shape == (B, T, vocab_size) and loss_nt is None
    assert jnp.allclose(logits_nt.reshape(B * T, vocab_size), ref_logits, atol=1e-5)

    print("KERNEL_OK")
</pallas_src>

<mosaic_0001>
module attributes {stable_mosaic.version = 11 : i64} {
  func.func @_bigram_loss_kernel(%arg0: i32, %arg1: memref<128x1xi32, #tpu.memory_space<vmem>>, %arg2: memref<128x1xi32, #tpu.memory_space<vmem>>, %arg3: memref<128x128xf32, #tpu.memory_space<vmem>>, %arg4: memref<128x128xf32, #tpu.memory_space<vmem>>, %arg5: memref<128x1xf32, #tpu.memory_space<vmem>>) attributes {dimension_semantics = [#tpu.dimension_semantics<parallel>], iteration_bounds = array<i64: 1>, scalar_prefetch = 0 : i64, scratch_operands = 0 : i64, tpu.core_type = #tpu.core_type<tc>, window_params = [{transform_indices = @transform_0, window_bounds = array<i64: 128, 1>}, {transform_indices = @transform_1, window_bounds = array<i64: 128, 1>}, {pipeline_mode = #tpu.pipeline_mode<synchronous>, transform_indices = @transform_2, window_bounds = array<i64: 128, 128>}, {transform_indices = @transform_3, window_bounds = array<i64: 128, 128>}, {transform_indices = @transform_4, window_bounds = array<i64: 128, 1>}]} {
    %c0 = arith.constant 0 : index
    %c0_0 = arith.constant 0 : index
    %0 = vector.load %arg1[%c0, %c0_0] : memref<128x1xi32, #tpu.memory_space<vmem>>, vector<128x1xi32>
    %c0_1 = arith.constant 0 : index
    %c0_2 = arith.constant 0 : index
    %1 = vector.load %arg3[%c0_1, %c0_2] : memref<128x128xf32, #tpu.memory_space<vmem>>, vector<128x128xf32>
    %2 = tpu.iota {dimensions = array<i32: 1>} : vector<128x128xi32>
    %3 = vector.broadcast %0 : vector<128x1xi32> to vector<128x128xi32>
    %4 = arith.cmpi eq, %3, %2 : vector<128x128xi32>
    %5 = arith.extui %4 : vector<128x128xi1> to vector<128x128xi32>
    %6 = arith.sitofp %5 : vector<128x128xi32> to vector<128x128xf32>
    %cst = arith.constant dense<0.000000e+00> : vector<128x128xf32>
    %7 = tpu.matmul %6, %1, %cst {dimension_numbers = #tpu.dot_dimension_numbers<[1], [0], [0], [1], [0, 0, 1, 1], [], []>, precision = #tpu.contract_precision<fp32>} : vector<128x128xf32>, vector<128x128xf32>, vector<128x128xf32> -> vector<128x128xf32>
    %c0_3 = arith.constant 0 : index
    %c0_4 = arith.constant 0 : index
    %8 = vector.load %arg4[%c0_3, %c0_4] : memref<128x128xf32, #tpu.memory_space<vmem>>, vector<128x128xf32>
    tpu.vector_store %arg4[%c0_3, %c0_4], %7 {strides = array<i32>} : memref<128x128xf32, #tpu.memory_space<vmem>>, vector<128x128xf32>,
    %cst_5 = arith.constant dense<0xFF800000> : vector<128xf32>
    %9 = vector.multi_reduction <maximumf>, %7, %cst_5 [1] : vector<128x128xf32> to vector<128xf32>
    %10 = vector.shape_cast %9 : vector<128xf32> to vector<128x1xf32>
    %11 = vector.broadcast %10 : vector<128x1xf32> to vector<128x128xf32>
    %12 = arith.subf %7, %11 : vector<128x128xf32>
    %13 = math.exp %12 : vector<128x128xf32>
    %cst_6 = arith.constant dense<0.000000e+00> : vector<128xf32>
    %14 = vector.multi_reduction <add>, %13, %cst_6 [1] : vector<128x128xf32> to vector<128xf32>
    %15 = vector.shape_cast %14 : vector<128xf32> to vector<128x1xf32>
    %16 = math.log %15 : vector<128x1xf32>
    %17 = arith.addf %10, %16 : vector<128x1xf32>
    %18 = tpu.iota {dimensions = array<i32: 1>} : vector<128x128xi32>
    %c0_7 = arith.constant 0 : index
    %c0_8 = arith.constant 0 : index
    %19 = vector.load %arg2[%c0_7, %c0_8] : memref<128x1xi32, #tpu.memory_space<vmem>>, vector<128x1xi32>
    %20 = vector.broadcast %19 : vector<128x1xi32> to vector<128x128xi32>
    %21 = arith.cmpi eq, %18, %20 : vector<128x128xi32>
    %cst_9 = arith.constant 0.000000e+00 : f32
    %22 = vector.broadcast %cst_9 : f32 to vector<128x128xf32>
    %23 = arith.select %21, %7, %22 : vector<128x128xi1>, vector<128x128xf32>
    %cst_10 = arith.constant dense<0.000000e+00> : vector<128xf32>
    %24 = vector.multi_reduction <add>, %23, %cst_10 [1] : vector<128x128xf32> to vector<128xf32>
    %25 = vector.shape_cast %24 : vector<128xf32> to vector<128x1xf32>
    %26 = arith.subf %17, %25 : vector<128x1xf32>
    %c0_11 = arith.constant 0 : index
    %c0_12 = arith.constant 0 : index
    %27 = vector.load %arg5[%c0_11, %c0_12] : memref<128x1xf32, #tpu.memory_space<vmem>>, vector<128x1xf32>
    tpu.vector_store %arg5[%c0_11, %c0_12], %26 {strides = array<i32>} : memref<128x1xf32, #tpu.memory_space<vmem>>, vector<128x1xf32>,
    return
  }
  func.func @transform_0(%arg0: i32) -> (i32, i32) {
    %c0_i32 = arith.constant 0 : i32
    %c0_i32_0 = arith.constant 0 : i32
    return %arg0, %c0_i32 : i32, i32
  }
  func.func @transform_1(%arg0: i32) -> (i32, i32) {
    %c0_i32 = arith.constant 0 : i32
    %c0_i32_0 = arith.constant 0 : i32
    return %arg0, %c0_i32 : i32, i32
  }
  func.func @transform_2(%arg0: i32) -> (i32, i32) {
    %c0_i32 = arith.constant 0 : i32
    %c0_i32_0 = arith.constant 0 : i32
    %c0_i32_1 = arith.constant 0 : i32
    return %c0_i32, %c0_i32_0 : i32, i32
  }
  func.func @transform_3(%arg0: i32) -> (i32, i32) {
    %c0_i32 = arith.constant 0 : i32
    %c0_i32_0 = arith.constant 0 : i32
    return %arg0, %c0_i32 : i32, i32
  }
  func.func @transform_4(%arg0: i32) -> (i32, i32) {
    %c0_i32 = arith.constant 0 : i32
    %c0_i32_0 = arith.constant 0 : i32
    return %arg0, %c0_i32 : i32, i32
  }
}

</mosaic_0001>

<bundles_post_ra>
// kernel: _bigram_with_loss.1
= control target key start
LH: loop header
LB: loop body
LE: loop exit
PB: predicated region body
PF: predicated region fallthrough
CT: control target
= control target key end

     0   :  { %v1463_v0 = vmov 0   ;;  %s2751_s0 = inlined_call_operand.vmem [shape: s32[128,1], index: 0, kind: input, shape index: {}]   ;;  %s2752_s1 = inlined_call_operand.vmem [shape: s32[128,1], index: 1, kind: input, shape index: {}]   ;;  %s2753_s2 = inlined_call_operand.vmem [shape: f32[128,128], index: 2, kind: input, shape index: {}]   ;;  %s2754_s3 = inlined_call_operand.vmem [shape: f32[128,128], index: 3, kind: output, shape index: {0}]   ;;  %s2755_s4 = inlined_call_operand.vmem [shape: f32[128,1], index: 4, kind: output, shape index: {1}]  }
   0x1   :  { %1398 = vset.pattern.permute.xlu2 %v1463_v0  ;;  %1397 = vset.pattern.permute.xlu1 %v1463_v0  ;;  %v24_v1 = vld [vmem:[%s2751_s0 + $0x40] sm:$0xff]  ;;  %v17_v2 = vld [vmem:[%s2751_s0 + $0x8] sm:$0xff]  ;;  %v27_v4 = vld [vmem:[%s2751_s0 + $0x58] sm:$0xff] }
   0x2   :  { %v16_v3 = vld [vmem:[%s2751_s0] sm:$0xff]  ;;  %1396 = vset.pattern.permute.xlu0 %v1463_v0  ;;  %54 = vperm.xlu2 %1398, %v17_v2   ;;  %v25_v5 = vld [vmem:[%s2751_s0 + $0x48] sm:$0xff]  ;;  %v26_v6 = vld [vmem:[%s2751_s0 + $0x50] sm:$0xff] }
   0x3   :  { %75 = vperm.xlu0 %1396, %v24_v1   ;;  %51 = vperm.xlu1 %1397, %v16_v3   ;;  %v19_v7 = vld [vmem:[%s2751_s0 + $0x18] sm:$0xff]  ;;  %v18_v8 = vld [vmem:[%s2751_s0 + $0x10] sm:$0xff]  ;;  %v28_v9 = vld [vmem:[%s2751_s0 + $0x60] sm:$0xff] }
   0x4   :  { %v30_v10 = vld [vmem:[%s2751_s0 + $0x70] sm:$0xff]  ;;  %v29_v11 = vld [vmem:[%s2751_s0 + $0x68] sm:$0xff]  ;;  %v20_v12 = vld [vmem:[%s2751_s0 + $0x20] sm:$0xff] }
   0x5   :  { %v22_v13 = vld [vmem:[%s2751_s0 + $0x30] sm:$0xff]  ;;  %v21_v14 = vld [vmem:[%s2751_s0 + $0x28] sm:$0xff]  ;;  %v31_v15 = vld [vmem:[%s2751_s0 + $0x78] sm:$0xff] }
   0x6   :  { %v1128_v16 = vld [vmem:[%s2752_s1] sm:$0xff]  ;;  %v23_v17 = vld [vmem:[%s2751_s0 + $0x38] sm:$0xff]  ;;  %v1130_v18 = vld [vmem:[%s2752_s1 + $0x10] sm:$0xff] }
   0x7   :  { %v47_v19 = vld [vmem:[%s2753_s2 + $0x78] sm:$0xff]  ;;  %v1132_v21 = vld [vmem:[%s2752_s1 + $0x20] sm:$0xff]  ;;  %v46_v22 = vld [vmem:[%s2753_s2 + $0x70] sm:$0xff] }
   0x8   :  { %v1548_v20 = vand.u32 4294901760, %v47_v19  ;;  %v1129_v23 = vld [vmem:[%s2752_s1 + $0x8] sm:$0xff]  ;;  %v1565_v26 = vand.u32 4294901760, %v46_v22  ;;  %v44_v31 = vld [vmem:[%s2753_s2 + $0x60] sm:$0xff]  ;;  %v43_v36 = vld [vmem:[%s2753_s2 + $0x58] sm:$0xff] }
   0x9   :  { %v1133_v24 = vld [vmem:[%s2752_s1 + $0x28] sm:$0xff]  ;;  %v1589_v35 = vand.u32 4294901760, %v44_v31  ;;  %v1135_v41 = vld [vmem:[%s2752_s1 + $0x38] sm:$0xff]  ;;  %v1608_v42 = vand.u32 4294901760, %v43_v36  ;;  %v42_v43 = vld [vmem:[%s2753_s2 + $0x50] sm:$0xff] }
   0xa   :  { %84 = vperm.xlu2 %1398, %v27_v4   ;;  %v1563_v25 = vsub.f32 %v47_v19, %v1548_v20  ;;  %147 = vmatpush.msra.mxu0 %v1548_v20  ;;  %v45_v27 = vld [vmem:[%s2753_s2 + $0x68] sm:$0xff]  ;;  %v1574_v29 = vsub.f32 %v46_v22, %v1565_v26  ;;  %v1131_v44 = vld [vmem:[%s2752_s1 + $0x18] sm:$0xff]  ;;  %v1136_v45 = vld [vmem:[%s2752_s1 + $0x40] sm:$0xff]  ;;  %v1623_v49 = vand.u32 4294901760, %v42_v43 }
   0xb   :  { %78 = vperm.xlu0 %1396, %v25_v5   ;;  %81 = vperm.xlu1 %1397, %v26_v6   ;;  %v1576_v30 = vand.u32 4294901760, %v45_v27  ;;  %v1601_v40 = vsub.f32 %v44_v31, %v1589_v35  ;;  %v1626_v50 = vsub.f32 %v43_v36, %v1608_v42  ;;  %v41_v51 = vld [vmem:[%s2753_s2 + $0x48] sm:$0xff]  ;;  %v40_v57 = vld [vmem:[%s2753_s2 + $0x40] sm:$0xff]  ;;  %v39_v63 = vld [vmem:[%s2753_s2 + $0x38] sm:$0xff] }
   0xc   :  { %1361 = vmatpush.msra.mxu2 %v1548_v20  ;;  %v309_v28 = vand.u32 4294901760, %v1563_v25  ;;  %149 = vmatpush.msra.mxu0 %v1565_v26  ;;  %v315_v33 = vand.u32 4294901760, %v1574_v29  ;;  %v1637_v54 = vsub.f32 %v42_v43, %v1623_v49  ;;  %v1639_v55 = vand.u32 4294901760, %v41_v51  ;;  %v1138_v4 = vld [vmem:[%s2752_s1 + $0x50] sm:$0xff]  ;;  %v1141_v43 = vld [vmem:[%s2752_s1 + $0x68] sm:$0xff] }
   0xd   :  { %v1587_v34 = vsub.f32 %v45_v27, %v1576_v30  ;;  %v327_v48 = vand.u32 4294901760, %v1601_v40  ;;  %v333_v56 = vand.u32 4294901760, %v1626_v50  ;;  %v1649_v61 = vand.u32 4294901760, %v40_v57  ;;  %v38_v6 = vld [vmem:[%s2753_s2 + $0x30] sm:$0xff] }
   0xe   :  { %v310_v32 = vsub.f32 %v1563_v25, %v309_v28  ;;  %1362 = vmatpush.msra.mxu2 %v1565_v26  ;;  %151 = vmatpush.msra.mxu0 %v1576_v30  ;;  %v316_v38 = vsub.f32 %v1574_v29, %v315_v33  ;;  %v339_v59 = vand.u32 4294901760, %v1637_v54  ;;  %v1647_v60 = vsub.f32 %v41_v51, %v1639_v55 }
   0xf   :  { %v321_v39 = vand.u32 4294901760, %v1587_v34  ;;  %v328_v53 = vsub.f32 %v1601_v40, %v327_v48  ;;  %v334_v62 = vsub.f32 %v1626_v50, %v333_v56  ;;  %v1664_v2 = vsub.f32 %v40_v57, %v1649_v61 }
  0x10   :  { %v311_v37 = vand.u32 4294901760, %v310_v32  ;;  %1363 = vmatpush.msra.mxu2 %v1576_v30  ;;  %153 = vmatpush.msra.mxu0 %v1589_v35  ;;  %v317_v46 = vand.u32 4294901760, %v316_v38  ;;  %v340_v0 = vsub.f32 %v1637_v54, %v339_v59  ;;  %v345_v1 = vand.u32 4294901760, %v1647_v60  ;;  %v35_v32 = vld [vmem:[%s2753_s2 + $0x18] sm:$0xff] }
  0x11   :  { %v322_v47 = vsub.f32 %v1587_v34, %v321_v39  ;;  %v329_v58 = vand.u32 4294901760, %v328_v53  ;;  %v1666_v3 = vand.u32 4294901760, %v39_v63  ;;  %v335_v5 = vand.u32 4294901760, %v334_v62  ;;  %v33_v62 = vld [vmem:[%s2753_s2 + $0x8] sm:$0xff] }
  0x12   :  { %60 = vperm.xlu2 %1398, %v19_v7   ;;  %312 = vmatpush.msra.mxu1 %v311_v37  ;;  %v1134_v7 = vld [vmem:[%s2752_s1 + $0x30] sm:$0xff] }
  0x13   :  { %57 = vperm.xlu0 %1396, %v18_v8   ;;  %87 = vperm.xlu1 %1397, %v28_v9   ;;  %v323_v52 = vand.u32 4294901760, %v322_v47  ;;  %v1139_v8 = vld [vmem:[%s2752_s1 + $0x58] sm:$0xff]  ;;  %v341_v9 = vand.u32 4294901760, %v340_v0  ;;  %v1142_v47 = vld [vmem:[%s2752_s1 + $0x70] sm:$0xff] }
  0x14   :  { %1377 = vmatpush.msra.mxu3 %v311_v37  ;;  %1364 = vmatpush.msra.mxu2 %v1589_v35 }
  0x15   :  { %155 = vmatpush.msra.mxu0 %v1608_v42  ;;  %318 = vmatpush.msra.mxu1 %v317_v46 }
  0x16   :  { %1378 = vmatpush.msra.mxu3 %v317_v46  ;;  %1365 = vmatpush.msra.mxu2 %v1608_v42  ;;  %v1137_v46 = vld [vmem:[%s2752_s1 + $0x48] sm:$0xff] }
  0x17   :  { %324 = vmatpush.msra.mxu1 %v323_v52  ;;  %157 = vmatpush.msra.mxu0 %v1623_v49 }
  0x18   :  { %1379 = vmatpush.msra.mxu3 %v323_v52  ;;  %1366 = vmatpush.msra.mxu2 %v1623_v49 }
  0x19   :  { %330 = vmatpush.msra.mxu1 %v329_v58  ;;  %159 = vmatpush.msra.mxu0 %v1639_v55 }
  0x1a   :  { %93 = vperm.xlu2 %1398, %v30_v10   ;;  %1380 = vmatpush.msra.mxu3 %v329_v58  ;;  %v346_v10 = vsub.f32 %v1647_v60, %v345_v1 }
  0x1b   :  { %90 = vperm.xlu0 %1396, %v29_v11   ;;  %63 = vperm.xlu1 %1397, %v20_v12   ;;  %v351_v11 = vand.u32 4294901760, %v1664_v2  ;;  %v1687_v12 = vsub.f32 %v39_v63, %v1666_v3 }
  0x1c   :  { %336 = vmatpush.msra.mxu1 %v335_v5  ;;  %1367 = vmatpush.msra.mxu2 %v1639_v55 }
  0x1d   :  { %1381 = vmatpush.msra.mxu3 %v335_v5  ;;  %161 = vmatpush.msra.mxu0 %v1649_v61 }
  0x1e   :  { %342 = vmatpush.msra.mxu1 %v341_v9  ;;  %1368 = vmatpush.msra.mxu2 %v1649_v61 }
  0x1f   :  { %1382 = vmatpush.msra.mxu3 %v341_v9  ;;  %163 = vmatpush.msra.mxu0 %v1666_v3 }
  0x20   :  { %1369 = vmatpush.msra.mxu2 %v1666_v3 }
  0x22   :  { %69 = vperm.xlu2 %1398, %v22_v13   ;;  %v1689_v13 = vand.u32 4294901760, %v38_v6 }
  0x23   :  { %66 = vperm.xlu0 %1396, %v21_v14   ;;  %96 = vperm.xlu1 %1397, %v31_v15   ;;  %v37_v14 = vld [vmem:[%s2753_s2 + $0x28] sm:$0xff]  ;;  %v347_v15 = vand.u32 4294901760, %v346_v10 }
  0x24   :  { %v1702_v19 = vsub.f32 %v38_v6, %v1689_v13  ;;  %165 = vmatpush.msra.mxu0 %v1689_v13  ;;  %1370 = vmatpush.msra.mxu2 %v1689_v13  ;;  %v1765_v6 = vand.u32 4294901760, %v33_v62 }
  0x25   :  { %348 = vmatpush.msra.mxu1 %v347_v15  ;;  %1383 = vmatpush.msra.mxu3 %v347_v15 }
  0x26   :  { %v363_v31 = vand.u32 4294901760, %v1702_v19  ;;  %v1777_v15 = vsub.f32 %v33_v62, %v1765_v6 }
  0x2a   :  { %1145 = vperm.xlu2 %1398, %v1128_v16   ;;  %v352_v16 = vsub.f32 %v1664_v2, %v351_v11 }
  0x2b   :  { %72 = vperm.xlu0 %1396, %v23_v17   ;;  %1151 = vperm.xlu1 %1397, %v1130_v18   ;;  %v357_v17 = vand.u32 4294901760, %v1687_v12  ;;  %v1699_v18 = vand.u32 4294901760, %v37_v14 }
  0x2c   :  { %v353_v22 = vand.u32 4294901760, %v352_v16 }
  0x2d   :  { %167 = vmatpush.msra.mxu0 %v1699_v18  ;;  %1371 = vmatpush.msra.mxu2 %v1699_v18 }
  0x2e   :  { %354 = vmatpush.msra.mxu1 %v353_v22  ;;  %1384 = vmatpush.msra.mxu3 %v353_v22 }
  0x32   :  { %1157 = vperm.xlu2 %1398, %v1132_v21   ;;  %v36_v21 = vld [vmem:[%s2753_s2 + $0x20] sm:$0xff] }
  0x33   :  { %1148 = vperm.xlu0 %1396, %v1129_v23   ;;  %1160 = vperm.xlu1 %1397, %v1133_v24   ;;  %v358_v23 = vsub.f32 %v1687_v12, %v357_v17  ;;  %v1711_v24 = vsub.f32 %v37_v14, %v1699_v18  ;;  %v1713_v27 = vand.u32 4294901760, %v36_v21 }
  0x35   :  { %v359_v36 = vand.u32 4294901760, %v358_v23  ;;  %v369_v37 = vand.u32 4294901760, %v1711_v24  ;;  %v1723_v38 = vsub.f32 %v36_v21, %v1713_v27  ;;  %v393_v23 = vand.u32 4294901760, %v1777_v15  ;;  %169 = vmatpush.msra.mxu0 %v1713_v27  ;;  %1372 = vmatpush.msra.mxu2 %v1713_v27 }
  0x37   :  { %v370_v51 = vsub.f32 %v1711_v24, %v369_v37  ;;  %v375_v52 = vand.u32 4294901760, %v1723_v38  ;;  %360 = vmatpush.msra.mxu1 %v359_v36  ;;  %1385 = vmatpush.msra.mxu3 %v359_v36 }
  0x39   :  { %v371_v63 = vand.u32 4294901760, %v370_v51  ;;  %v376_v0 = vsub.f32 %v1723_v38, %v375_v52  ;;  %v1143_v51 = vld [vmem:[%s2752_s1 + $0x78] sm:$0xff] }
  0x3a   :  { %1166 = vperm.xlu2 %1398, %v1135_v41   ;;  %v1725_v41 = vand.u32 4294901760, %v35_v32 }
  0x3b   :  { %1154 = vperm.xlu0 %1396, %v1131_v44   ;;  %1169 = vperm.xlu1 %1397, %v1136_v45   ;;  %v364_v44 = vsub.f32 %v1702_v19, %v363_v31  ;;  %v34_v45 = vld [vmem:[%s2753_s2 + $0x10] sm:$0xff] }
  0x3c   :  { %v1749_v53 = vsub.f32 %v35_v32, %v1725_v41  ;;  %v1751_v57 = vand.u32 4294901760, %v34_v45  ;;  %v1140_v32 = vld [vmem:[%s2752_s1 + $0x60] sm:$0xff]  ;;  %171 = vmatpush.msra.mxu0 %v1725_v41  ;;  %1373 = vmatpush.msra.mxu2 %v1725_v41 }
  0x3d   :  { %v365_v58 = vand.u32 4294901760, %v364_v44  ;;  %v394_v44 = vsub.f32 %v1777_v15, %v393_v23 }
  0x3e   :  { %v1763_v5 = vsub.f32 %v34_v45, %v1751_v57  ;;  %173 = vmatpush.msra.mxu0 %v1751_v57  ;;  %1374 = vmatpush.msra.mxu2 %v1751_v57 }
  0x3f   :  { %366 = vmatpush.msra.mxu1 %v365_v58  ;;  %1386 = vmatpush.msra.mxu3 %v365_v58 }
  0x40   :  { %v387_v10 = vand.u32 4294901760, %v1763_v5  ;;  %175 = vmatpush.msra.mxu0 %v1765_v6  ;;  %1375 = vmatpush.msra.mxu2 %v1765_v6 }
  0x41   :  { %372 = vmatpush.msra.mxu1 %v371_v63  ;;  %1387 = vmatpush.msra.mxu3 %v371_v63 }
  0x42   :  { %1175 = vperm.xlu2 %1398, %v1138_v4   ;;  %v381_v4 = vand.u32 4294901760, %v1749_v53  ;;  %v388_v21 = vsub.f32 %v1763_v5, %v387_v10 }
  0x43   :  { %1163 = vperm.xlu0 %1396, %v1134_v7   ;;  %1178 = vperm.xlu1 %1397, %v1139_v8   ;;  %v32_v7 = vld [vmem:[%s2753_s2] sm:$0xff]  ;;  %v377_v8 = vand.u32 4294901760, %v376_v0 }
  0x44   :  { %v382_v9 = vsub.f32 %v1749_v53, %v381_v4  ;;  %v1774_v14 = vand.u32 4294901760, %v32_v7  ;;  %v389_v36 = vand.u32 4294901760, %v388_v21 }
  0x45   :  { %378 = vmatpush.msra.mxu1 %v377_v8  ;;  %1388 = vmatpush.msra.mxu3 %v377_v8 }
  0x46   :  { %v383_v16 = vand.u32 4294901760, %v382_v9  ;;  %v1785_v22 = vsub.f32 %v32_v7, %v1774_v14  ;;  %177 = vmatpush.msra.mxu0 %v1774_v14  ;;  %1376 = vmatpush.msra.mxu2 %v1774_v14 }
  0x48   :  { %384 = vmatpush.msra.mxu1 %v383_v16  ;;  %1389 = vmatpush.msra.mxu3 %v383_v16 }
  0x49   :  { %729 = vmatpush.msrb.mxu0 %v309_v28  ;;  %470 = vmatpush.msrb.mxu2 %v1563_v25  ;;  %v1464_v28 = vmov 0.0  }
  0x4a   :  { %1184 = vperm.xlu2 %1398, %v1141_v43   ;;  %v399_v43 = vand.u32 4294901760, %v1785_v22  ;;  %390 = vmatpush.msra.mxu1 %v389_v36 }
  0x4b   :  { %1172 = vperm.xlu0 %1396, %v1137_v46   ;;  %1187 = vperm.xlu1 %1397, %v1142_v47   ;;  %v395_v46 = vand.u32 4294901760, %v394_v44 }
  0x4c   :  { %v400_v45 = vsub.f32 %v1785_v22, %v399_v43  ;;  %1390 = vmatpush.msra.mxu3 %v389_v36  ;;  %473 = vmatpush.msrb.mxu2 %v1574_v29 }
  0x4d   :  { %396 = vmatpush.msra.mxu1 %v395_v46  ;;  %733 = vmatpush.msrb.mxu0 %v315_v33 }
  0x4e   :  { %v401_v47 = vand.u32 4294901760, %v400_v45  ;;  %1391 = vmatpush.msra.mxu3 %v395_v46  ;;  %476 = vmatpush.msrb.mxu2 %v1587_v34 }
  0x4f   :  { %737 = vmatpush.msrb.mxu0 %v321_v39  ;;  %v1465_v39 = vmov 1.0  }
  0x50   :  { %402 = vmatpush.msra.mxu1 %v401_v47  ;;  %1392 = vmatpush.msra.mxu3 %v401_v47 }
  0x51   :  { %479 = vmatpush.msrb.mxu2 %v1601_v40  ;;  %741 = vmatpush.msrb.mxu0 %v327_v48 }
  0x52   :  { %598 = vmatpush.msrb.mxu3 %v1548_v20  ;;  %856 = vmatpush.msrb.mxu1 %v1548_v20  ;;  %v48_v20 = vlaneseq }
  0x53   :  { %1181 = vperm.xlu0 %1396, %v1140_v32   ;;  %482 = vmatpush.msrb.mxu2 %v1626_v50 }
  0x54   :  { %600 = vmatpush.msrb.mxu3 %v1565_v26  ;;  %858 = vmatpush.msrb.mxu1 %v1565_v26  ;;  %v1867_v26 = vand.u32 127, %v48_v20 }
  0x55   :  { %745 = vmatpush.msrb.mxu0 %v333_v56  ;;  %485 = vmatpush.msrb.mxu2 %v1637_v54 }
  0x56   :  { %602 = vmatpush.msrb.mxu3 %v1576_v30  ;;  %860 = vmatpush.msrb.mxu1 %v1576_v30 }
  0x57   :  { %749 = vmatpush.msrb.mxu0 %v339_v59  ;;  %488 = vmatpush.msrb.mxu2 %v1647_v60 }
  0x58   :  { %604 = vmatpush.msrb.mxu3 %v1589_v35  ;;  %862 = vmatpush.msrb.mxu1 %v1589_v35 }
  0x59   :  { %753 = vmatpush.msrb.mxu0 %v345_v1  ;;  %491 = vmatpush.msrb.mxu2 %v1664_v2 }
  0x5a   :  { %606 = vmatpush.msrb.mxu3 %v1608_v42  ;;  %864 = vmatpush.msrb.mxu1 %v1608_v42 }
  0x5b   :  { %1190 = vperm.xlu0 %1396, %v1143_v51   ;;  %757 = vmatpush.msrb.mxu0 %v351_v11 }
  0x5c   :  { %608 = vmatpush.msrb.mxu3 %v1623_v49  ;;  %866 = vmatpush.msrb.mxu1 %v1623_v49  ;;  %v1862_v25 = vpop.permute.xlu2 %54 }
  0x5d   :  { %494 = vmatpush.msrb.mxu2 %v1687_v12  ;;  %761 = vmatpush.msrb.mxu0 %v357_v17  ;;  %vm99_vm0 = vcmp.eq.s32.totalorder %v1862_v25, %v1867_v26 }
  0x5e   :  { %610 = vmatpush.msrb.mxu3 %v1639_v55  ;;  %868 = vmatpush.msrb.mxu1 %v1639_v55  ;;  %v1298_v29 = vsel %vm99_vm0, 1.0, %v1464_v28 }
  0x5f   :  { %497 = vmatpush.msrb.mxu2 %v1702_v19  ;;  %765 = vmatpush.msrb.mxu0 %v363_v31  ;;  %v1916_v40 = vsub.f32 %v1298_v29, %v1298_v29 }
  0x60   :  { %612 = vmatpush.msrb.mxu3 %v1649_v61  ;;  %870 = vmatpush.msrb.mxu1 %v1649_v61 }
  0x61   :  { %500 = vmatpush.msrb.mxu2 %v1711_v24  ;;  %769 = vmatpush.msrb.mxu0 %v369_v37  ;;  %v188_v59 = vand.u32 4294901760, %v1916_v40 }
  0x62   :  { %614 = vmatpush.msrb.mxu3 %v1666_v3  ;;  %872 = vmatpush.msrb.mxu1 %v1666_v3 }
  0x63   :  { %503 = vmatpush.msrb.mxu2 %v1723_v38  ;;  %773 = vmatpush.msrb.mxu0 %v375_v52 }
  0x64   :  { %616 = vmatpush.msrb.mxu3 %v1689_v13  ;;  %874 = vmatpush.msrb.mxu1 %v1689_v13  ;;  %v1924_v49 = vpop.permute.xlu2 %84  ;;  %v189_v13 = vsub.f32 %v1916_v40, %v188_v59 }
  0x65   :  { %506 = vmatpush.msrb.mxu2 %v1749_v53  ;;  %777 = vmatpush.msrb.mxu0 %v381_v4  ;;  %vm109_vm6 = vcmp.eq.s32.totalorder %v1924_v49, %v1867_v26 }
  0x66   :  { %618 = vmatpush.msrb.mxu3 %v1699_v18  ;;  %876 = vmatpush.msrb.mxu1 %v1699_v18  ;;  %v190_v24 = vand.u32 4294901760, %v189_v13 }
  0x67   :  { %509 = vmatpush.msrb.mxu2 %v1763_v5  ;;  %781 = vmatpush.msrb.mxu0 %v387_v10 }
  0x68   :  { %620 = vmatpush.msrb.mxu3 %v1713_v27  ;;  %878 = vmatpush.msrb.mxu1 %v1713_v27 }
  0x69   :  { %512 = vmatpush.msrb.mxu2 %v1777_v15  ;;  %785 = vmatpush.msrb.mxu0 %v393_v23 }
  0x6a   :  { %622 = vmatpush.msrb.mxu3 %v1725_v41  ;;  %880 = vmatpush.msrb.mxu1 %v1725_v41 }
  0x6b   :  { %515 = vmatpush.msrb.mxu2 %v1785_v22  ;;  %789 = vmatpush.msrb.mxu0 %v399_v43 }
  0x6c   :  { %624 = vmatpush.msrb.mxu3 %v1751_v57  ;;  %882 = vmatpush.msrb.mxu1 %v1751_v57  ;;  %v1972_v18 = vpop.permute.xlu2 %60  ;;  %v1308_v57 = vsel %vm109_vm6, 1.0, %v1464_v28 }
  0x6d   :  { %vm101_vm5 = vcmp.eq.s32.totalorder %v1972_v18, %v1867_v26  ;;  %v2015_v0 = vsub.f32 %v1308_v57, %v1308_v57 }
  0x6e   :  { %626 = vmatpush.msrb.mxu3 %v1765_v6  ;;  %884 = vmatpush.msrb.mxu1 %v1765_v6  ;;  %v1300_v41 = vsel %vm101_vm5, 1.0, %v1464_v28 }
  0x6f   :  { %v2012_v62 = vsub.f32 %v1300_v41, %v1300_v41  ;;  %v268_v15 = vand.u32 4294901760, %v2015_v0 }
  0x70   :  { %628 = vmatpush.msrb.mxu3 %v1774_v14  ;;  %886 = vmatpush.msrb.mxu1 %v1774_v14 }
  0x71   :  { %v204_v9 = vand.u32 4294901760, %v2012_v62  ;;  %v269_v36 = vsub.f32 %v2015_v0, %v268_v15 }
  0x73   :  { %v205_v23 = vsub.f32 %v2012_v62, %v204_v9  ;;  %v270_v47 = vand.u32 4294901760, %v269_v36 }
  0x74   :  { %v2049_v21 = vpop.permute.xlu2 %93 }
  0x75   :  { %v1887_v30 = vpop.permute.xlu0 %75  ;;  %v1889_v33 = vpop.permute.xlu1 %51  ;;  %v206_v44 = vand.u32 4294901760, %v205_v23  ;;  %vm112_vm13 = vcmp.eq.s32.totalorder %v2049_v21, %v1867_v26 }
  0x76   :  { %vm106_vm1 = vcmp.eq.s32.totalorder %v1887_v30, %v1867_v26  ;;  %vm98_vm2 = vcmp.eq.s32.totalorder %v1889_v33, %v1867_v26 }
  0x77   :  { %v1305_v34 = vsel %vm106_vm1, 1.0, %v1464_v28  ;;  %v1297_v35 = vsel %vm98_vm2, 1.0, %v1464_v28  ;;  %1313 = vmatmul.msk.f32.vlgmr.msra.gmra.mxu1 %vm98_vm2, %v1465_v39  ;;  %1321 = vmatmul.msk.f32.vlgmr.msra.gmra.mxu3 %vm106_vm1, %v1465_v39 }
  0x78   :  { %v1918_v42 = vsub.f32 %v1305_v34, %v1305_v34  ;;  %v1920_v48 = vsub.f32 %v1297_v35, %v1297_v35 }
  0x7a   :  { %v180_v50 = vand.u32 4294901760, %v1920_v48  ;;  %v244_v54 = vand.u32 4294901760, %v1918_v42 }
  0x7c   :  { %v181_v55 = vsub.f32 %v1920_v48, %v180_v50  ;;  %v245_v56 = vsub.f32 %v1918_v42, %v244_v54  ;;  %v2090_v35 = vpop.permute.xlu2 %69 }
  0x7d   :  { %v1942_v60 = vpop.permute.xlu0 %78  ;;  %v1944_v61 = vpop.permute.xlu1 %81  ;;  %vm104_vm12 = vcmp.eq.s32.totalorder %v2090_v35, %v1867_v26 }
  0x7e   :  { %vm107_vm3 = vcmp.eq.s32.totalorder %v1942_v60, %v1867_v26  ;;  %vm108_vm4 = vcmp.eq.s32.totalorder %v1944_v61, %v1867_v26  ;;  %v182_v1 = vand.u32 4294901760, %v181_v55  ;;  %v246_v3 = vand.u32 4294901760, %v245_v56 }
  0x7f   :  { %v1306_v2 = vsel %vm107_vm3, 1.0, %v1464_v28  ;;  %1314 = vmatmul.msk.f32.gmra.mxu1 %vm99_vm0, %v1465_v39  ;;  %1322 = vmatmul.msk.f32.gmra.mxu3 %vm107_vm3, %v1465_v39  ;;  %v1307_v12 = vsel %vm108_vm4, 1.0, %v1464_v28 }
  0x80   :  { %v1962_v11 = vsub.f32 %v1306_v2, %v1306_v2  ;;  %183 = vmatmul.f32.vlgmr.msra.gmra.mxu0 %v182_v1  ;;  %247 = vmatmul.f32.vlgmr.msra.gmra.mxu2 %v246_v3  ;;  %v1974_v19 = vsub.f32 %v1307_v12, %v1307_v12  ;;  %v1303_v3 = vsel %vm104_vm12, 1.0, %v1464_v28 }
  0x82   :  { %v252_v17 = vand.u32 4294901760, %v1962_v11  ;;  %v260_v53 = vand.u32 4294901760, %v1974_v19 }
  0x84   :  { %v253_v27 = vsub.f32 %v1962_v11, %v252_v17  ;;  %v261_v4 = vsub.f32 %v1974_v19, %v260_v53 }
  0x85   :  { %v1983_v31 = vpop.permute.xlu0 %57  ;;  %v1985_v37 = vpop.permute.xlu1 %87 }
  0x86   :  { %vm100_vm7 = vcmp.eq.s32.totalorder %v1983_v31, %v1867_v26  ;;  %v254_v38 = vand.u32 4294901760, %v253_v27  ;;  %vm110_vm8 = vcmp.eq.s32.totalorder %v1985_v37, %v1867_v26  ;;  %v262_v14 = vand.u32 4294901760, %v261_v4 }
  0x87   :  { %v1299_v52 = vsel %vm100_vm7, 1.0, %v1464_v28  ;;  %1315 = vmatmul.msk.f32.gmra.mxu1 %vm100_vm7, %v1465_v39  ;;  %1323 = vmatmul.msk.f32.gmra.mxu3 %vm108_vm4, %v1465_v39  ;;  %v1309_v16 = vsel %vm110_vm8, 1.0, %v1464_v28 }
  0x88   :  { %v2010_v58 = vsub.f32 %v1299_v52, %v1299_v52  ;;  %191 = vmatmul.f32.gmra.mxu0 %v190_v24  ;;  %255 = vmatmul.f32.gmra.mxu2 %v254_v38  ;;  %v2056_v32 = vsub.f32 %v1309_v16, %v1309_v16  ;;  %v1311_v24 = vsel %vm112_vm13, 1.0, %v1464_v28  ;;  %v2121_v38 = vsub.f32 %v1303_v3, %v1303_v3 }
  0x89   :  { %v2126_v57 = vsub.f32 %v1311_v24, %v1311_v24 }
  0x8a   :  { %v196_v63 = vand.u32 4294901760, %v2010_v58  ;;  %v276_v51 = vand.u32 4294901760, %v2056_v32 }
  0x8b   :  { %v292_v16 = vand.u32 4294901760, %v2126_v57 }
  0x8c   :  { %v197_v5 = vsub.f32 %v2010_v58, %v196_v63  ;;  %v277_v56 = vsub.f32 %v2056_v32, %v276_v51 }
  0x8d   :  { %v2025_v6 = vpop.permute.xlu0 %90  ;;  %v2027_v7 = vpop.permute.xlu1 %63 }
  0x8e   :  { %vm102_vm9 = vcmp.eq.s32.totalorder %v2027_v7, %v1867_v26  ;;  %v198_v8 = vand.u32 4294901760, %v197_v5  ;;  %vm111_vm10 = vcmp.eq.s32.totalorder %v2025_v6, %v1867_v26  ;;  %v278_v12 = vand.u32 4294901760, %v277_v56 }
  0x8f   :  { %v1301_v10 = vsel %vm102_vm9, 1.0, %v1464_v28  ;;  %1316 = vmatmul.msk.f32.gmra.mxu1 %vm101_vm5, %v1465_v39  ;;  %1324 = vmatmul.msk.f32.gmra.mxu3 %vm109_vm6, %v1465_v39  ;;  %v1310_v20 = vsel %vm111_vm10, 1.0, %v1464_v28 }
  0x90   :  { %199 = vmatmul.f32.gmra.mxu0 %v198_v8  ;;  %263 = vmatmul.f32.gmra.mxu2 %v262_v14  ;;  %v2051_v22 = vsub.f32 %v1301_v10, %v1301_v10  ;;  %v2092_v55 = vsub.f32 %v1310_v20, %v1310_v20  ;;  %v228_v8 = vand.u32 4294901760, %v2121_v38 }
  0x92   :  { %v212_v45 = vand.u32 4294901760, %v2051_v22  ;;  %v284_v13 = vand.u32 4294901760, %v2092_v55 }
  0x94   :  { %v213_v34 = vsub.f32 %v2051_v22, %v212_v45  ;;  %v285_v4 = vsub.f32 %v2092_v55, %v284_v13 }
  0x95   :  { %v2063_v43 = vpop.permute.xlu0 %66  ;;  %v2123_v41 = vpop.permute.xlu1 %96 }
  0x96   :  { %vm103_vm11 = vcmp.eq.s32.totalorder %v2063_v43, %v1867_v26  ;;  %v214_v1 = vand.u32 4294901760, %v213_v34  ;;  %vm113_vm15 = vcmp.eq.s32.totalorder %v2123_v41, %v1867_v26  ;;  %v286_v14 = vand.u32 4294901760, %v285_v4 }
  0x97   :  { %v1302_v46 = vsel %vm103_vm11, 1.0, %v1464_v28  ;;  %1317 = vmatmul.msk.f32.gmra.mxu1 %vm102_vm9, %v1465_v39  ;;  %1325 = vmatmul.msk.f32.gmra.mxu3 %vm110_vm8, %v1465_v39  ;;  %v1312_v23 = vsel %vm113_vm15, 1.0, %v1464_v28 }
  0x98   :  { %207 = vmatmul.f32.gmra.mxu0 %v206_v44  ;;  %271 = vmatmul.f32.gmra.mxu2 %v270_v47  ;;  %v2085_v29 = vsub.f32 %v1302_v46, %v1302_v46  ;;  %v229_v44 = vsub.f32 %v2121_v38, %v228_v8  ;;  %v2154_v46 = vsub.f32 %v1312_v23, %v1312_v23 }
  0x99   :  { %v293_v47 = vsub.f32 %v2126_v57, %v292_v16 }
  0x9a   :  { %v220_v2 = vand.u32 4294901760, %v2085_v29  ;;  %v230_v20 = vand.u32 4294901760, %v229_v44  ;;  %v300_v56 = vand.u32 4294901760, %v2154_v46 }
  0x9c   :  { %v221_v52 = vsub.f32 %v2085_v29, %v220_v2  ;;  %v301_v3 = vsub.f32 %v2154_v46, %v300_v56 }
  0x9d   :  { %v2119_v27 = vpop.permute.xlu0 %72 }
  0x9e   :  { %vm105_vm14 = vcmp.eq.s32.totalorder %v2119_v27, %v1867_v26  ;;  %v222_v5 = vand.u32 4294901760, %v221_v52  ;;  %v302_v24 = vand.u32 4294901760, %v301_v3 }
  0x9f   :  { %1318 = vmatmul.msk.f32.gmra.mxu1 %vm103_vm11, %v1465_v39  ;;  %1326 = vmatmul.msk.f32.gmra.mxu3 %vm111_vm10, %v1465_v39  ;;  %v1304_v10 = vsel %vm105_vm14, 1.0, %v1464_v28  ;;  %v294_v28 = vand.u32 4294901760, %v293_v47  ;;  %v1146_v47 = vpop.permute.xlu2 %1145 }
  0xa0   :  { %215 = vmatmul.f32.gmra.mxu0 %v214_v1  ;;  %279 = vmatmul.f32.gmra.mxu2 %v278_v12  ;;  %v235_v36 = vsub.f32 %v1304_v10, %v1304_v10 }
  0xa2   :  { %v236_v34 = vand.u32 4294901760, %v235_v36 }
  0xa4   :  { %v237_v1 = vsub.f32 %v235_v36, %v236_v34 }
  0xa6   :  { %v238_v12 = vand.u32 4294901760, %v237_v1 }
  0xa7   :  { %1319 = vmatmul.msk.f32.gmra.mxu1 %vm104_vm12, %v1465_v39  ;;  %1327 = vmatmul.msk.f32.gmra.mxu3 %vm112_vm13, %v1465_v39 }
  0xa8   :  { %223 = vmatmul.f32.gmra.mxu0 %v222_v5  ;;  %287 = vmatmul.f32.gmra.mxu2 %v286_v14 }
  0xaf   :  { %1320 = vmatmul.msk.f32.gmra.mxu1 %vm105_vm14, %v1465_v39  ;;  %1328 = vmatmul.msk.f32.gmra.mxu3 %vm113_vm15, %v1465_v39 }
  0xb0   :  { %231 = vmatmul.f32.gmra.mxu0 %v230_v20  ;;  %295 = vmatmul.f32.gmra.mxu2 %v294_v28 }
  0xb7   :  { %632 = vmatmul.f32.vlgmr.msrb.gmra.mxu3 %v180_v50  ;;  %1345 = vmatmul.msk.f32.vlgmr.msrb.gmra.mxu1 %vm98_vm2, %v1465_v39 }
  0xb8   :  { %239 = vmatmul.f32.gmra.mxu0 %v238_v12  ;;  %303 = vmatmul.f32.gmra.mxu2 %v302_v24  ;;  %v1149_v24 = vpop.permute.xlu0 %1148 }
  0xbf   :  { %638 = vmatmul.f32.gmra.mxu3 %v188_v59  ;;  %1346 = vmatmul.msk.f32.gmra.mxu1 %vm99_vm0, %v1465_v39 }
  0xc0   :  { %1329 = vmatmul.msk.f32.vlgmr.msrb.gmra.mxu0 %vm98_vm2, %v1465_v39  ;;  %518 = vmatmul.f32.vlgmr.msrb.gmra.mxu2 %v1920_v48 }
  0xc7   :  { %644 = vmatmul.f32.gmra.mxu3 %v196_v63  ;;  %1347 = vmatmul.msk.f32.gmra.mxu1 %vm100_vm7, %v1465_v39 }
  0xc8   :  { %1330 = vmatmul.msk.f32.gmra.mxu0 %vm99_vm0, %v1465_v39  ;;  %523 = vmatmul.f32.gmra.mxu2 %v1916_v40  ;;  %vm1192_vm0 = vcmp.eq.s32.totalorder %v1867_v26, %v1146_v47 }
  0xcf   :  { %650 = vmatmul.f32.gmra.mxu3 %v204_v9  ;;  %1348 = vmatmul.msk.f32.gmra.mxu1 %vm101_vm5, %v1465_v39 }
  0xd0   :  { %1331 = vmatmul.msk.f32.gmra.mxu0 %vm100_vm7, %v1465_v39  ;;  %528 = vmatmul.f32.gmra.mxu2 %v2010_v58 }
  0xd7   :  { %656 = vmatmul.f32.gmra.mxu3 %v212_v45  ;;  %1349 = vmatmul.msk.f32.gmra.mxu1 %vm102_vm9, %v1465_v39 }
  0xd8   :  { %1332 = vmatmul.msk.f32.gmra.mxu0 %vm101_vm5, %v1465_v39  ;;  %533 = vmatmul.f32.gmra.mxu2 %v2012_v62 }
  0xdf   :  { %662 = vmatmul.f32.gmra.mxu3 %v220_v2  ;;  %1350 = vmatmul.msk.f32.gmra.mxu1 %vm103_vm11, %v1465_v39 }
  0xe0   :  { %1333 = vmatmul.msk.f32.gmra.mxu0 %vm102_vm9, %v1465_v39  ;;  %538 = vmatmul.f32.gmra.mxu2 %v2051_v22 }
  0xe7   :  { %668 = vmatmul.f32.gmra.mxu3 %v228_v8  ;;  %1351 = vmatmul.msk.f32.gmra.mxu1 %vm104_vm12, %v1465_v39 }
  0xe8   :  { %1334 = vmatmul.msk.f32.gmra.mxu0 %vm103_vm11, %v1465_v39  ;;  %543 = vmatmul.f32.gmra.mxu2 %v2085_v29 }
  0xef   :  { %674 = vmatmul.f32.gmra.mxu3 %v236_v34  ;;  %1352 = vmatmul.msk.f32.gmra.mxu1 %vm105_vm14, %v1465_v39 }
  0xf0   :  { %1335 = vmatmul.msk.f32.gmra.mxu0 %vm104_vm12, %v1465_v39  ;;  %548 = vmatmul.f32.gmra.mxu2 %v2121_v38 }
  0xf4   :  { %v2248_v25 = vpop.f32.mrf.mxu1 }
  0xf7   :  { %680 = vmatmul.f32.gmra.mxu3 %v244_v54  ;;  %1353 = vmatmul.msk.f32.gmra.mxu1 %vm106_vm1, %v1465_v39 }
  0xf8   :  { %1336 = vmatmul.msk.f32.gmra.mxu0 %vm105_vm14, %v1465_v39  ;;  %553 = vmatmul.f32.gmra.mxu2 %v235_v36 }
  0xfa   :  { %v437_v33 = vpop.f32.mrf.mxu3 }
  0xfc   :  { %v2260_v40 = vpop.f32.mrf.mxu1 }
  0xfd   :  { %v2262_v48 = vpop.f32.mrf.mxu0 }
  0xfe   :  { %v406_v10 = vadd.f32 %v2248_v25, %v2262_v48 }
  0xff   :  { %686 = vmatmul.f32.gmra.mxu3 %v252_v17  ;;  %1354 = vmatmul.msk.f32.gmra.mxu1 %vm107_vm3, %v1465_v39 }
 0x100   :  { %1337 = vmatmul.msk.f32.gmra.mxu0 %vm106_vm1, %v1465_v39  ;;  %558 = vmatmul.f32.gmra.mxu2 %v1918_v42  ;;  %vm1193_vm1 = vcmp.eq.s32.totalorder %v1867_v26, %v1149_v24 }
 0x102   :  { %v441_v50 = vpop.f32.mrf.mxu3 }
 0x103   :  { %v248_v54 = vpop.f32.mrf.mxu2 }
 0x104   :  { %v2275_v59 = vpop.f32.mrf.mxu1  ;;  %v2277_v18 = vadd.f32 %v437_v33, %v248_v54 }
 0x105   :  { %v2279_v31 = vpop.f32.mrf.mxu0 }
 0x107   :  { %692 = vmatmul.f32.gmra.mxu3 %v260_v53  ;;  %1355 = vmatmul.msk.f32.gmra.mxu1 %vm108_vm4, %v1465_v39 }
 0x108   :  { %1338 = vmatmul.msk.f32.gmra.mxu0 %vm107_vm3, %v1465_v39  ;;  %563 = vmatmul.f32.gmra.mxu2 %v1962_v11 }
 0x10a   :  { %v445_v30 = vpop.f32.mrf.mxu3 }
 0x10b   :  { %v256_v42 = vpop.f32.mrf.mxu2 }
 0x10c   :  { %v2292_v17 = vpop.f32.mrf.mxu1  ;;  %v2294_v58 = vadd.f32 %v441_v50, %v256_v42 }
 0x10d   :  { %v2296_v62 = vpop.f32.mrf.mxu0 }
 0x10f   :  { %698 = vmatmul.f32.gmra.mxu3 %v268_v15  ;;  %1356 = vmatmul.msk.f32.gmra.mxu1 %vm109_vm6, %v1465_v39 }
 0x110   :  { %1339 = vmatmul.msk.f32.gmra.mxu0 %vm108_vm4, %v1465_v39  ;;  %568 = vmatmul.f32.gmra.mxu2 %v1974_v19 }
 0x112   :  { %v449_v60 = vpop.f32.mrf.mxu3 }
 0x113   :  { %v264_v11 = vpop.f32.mrf.mxu2 }
 0x114   :  { %v2309_v53 = vpop.f32.mrf.mxu1  ;;  %v2311_v63 = vadd.f32 %v445_v30, %v264_v11 }
 0x115   :  { %v2313_v7 = vpop.f32.mrf.mxu0 }
 0x116   :  { %v418_v11 = vadd.f32 %v2292_v17, %v2313_v7 }
 0x117   :  { %704 = vmatmul.f32.gmra.mxu3 %v276_v51  ;;  %1357 = vmatmul.msk.f32.gmra.mxu1 %vm110_vm8, %v1465_v39 }
 0x118   :  { %1340 = vmatmul.msk.f32.gmra.mxu0 %vm109_vm6, %v1465_v39  ;;  %573 = vmatmul.f32.gmra.mxu2 %v2015_v0 }
 0x11a   :  { %v453_v61 = vpop.f32.mrf.mxu3 }
 0x11b   :  { %v272_v19 = vpop.f32.mrf.mxu2 }
 0x11c   :  { %v2326_v9 = vpop.f32.mrf.mxu1  ;;  %v2328_v15 = vadd.f32 %v449_v60, %v272_v19 }
 0x11d   :  { %v2330_v22 = vpop.f32.mrf.mxu0 }
 0x11e   :  { %v422_v17 = vadd.f32 %v2309_v53, %v2330_v22 }
 0x11f   :  { %710 = vmatmul.f32.gmra.mxu3 %v284_v13  ;;  %1358 = vmatmul.msk.f32.gmra.mxu1 %vm111_vm10, %v1465_v39 }
 0x120   :  { %1341 = vmatmul.msk.f32.gmra.mxu0 %vm110_vm8, %v1465_v39  ;;  %578 = vmatmul.f32.gmra.mxu2 %v2056_v32 }
 0x122   :  { %v457_v49 = vpop.f32.mrf.mxu3 }
 0x123   :  { %v280_v0 = vpop.f32.mrf.mxu2 }
 0x124   :  { %v2343_v43 = vpop.f32.mrf.mxu1  ;;  %v2345_v45 = vadd.f32 %v453_v61, %v280_v0 }
 0x125   :  { %v2347_v51 = vpop.f32.mrf.mxu0 }
 0x126   :  { %v426_v22 = vadd.f32 %v2326_v9, %v2347_v51 }
 0x127   :  { %716 = vmatmul.f32.gmra.mxu3 %v292_v16  ;;  %1359 = vmatmul.msk.f32.gmra.mxu1 %vm112_vm13, %v1465_v39 }
 0x128   :  { %1342 = vmatmul.msk.f32.gmra.mxu0 %vm111_vm10, %v1465_v39  ;;  %583 = vmatmul.f32.gmra.mxu2 %v2092_v55 }
 0x12a   :  { %v461_v37 = vpop.f32.mrf.mxu3 }
 0x12b   :  { %v288_v32 = vpop.f32.mrf.mxu2 }
 0x12c   :  { %v2360_v29 = vpop.f32.mrf.mxu1  ;;  %v2362_v35 = vadd.f32 %v457_v49, %v288_v32 }
 0x12d   :  { %v2364_v2 = vpop.f32.mrf.mxu0 }
 0x12f   :  { %722 = vmatmul.f32.gmra.mxu3 %v300_v56  ;;  %1360 = vmatmul.msk.f32.gmra.mxu1 %vm113_vm15, %v1465_v39 }
 0x130   :  { %1343 = vmatmul.msk.f32.gmra.mxu0 %vm112_vm13, %v1465_v39  ;;  %588 = vmatmul.f32.gmra.mxu2 %v2126_v57 }
 0x132   :  { %v465_v6 = vpop.f32.mrf.mxu3 }
 0x133   :  { %v296_v55 = vpop.f32.mrf.mxu2 }
 0x134   :  { %v889_v13 = vpop.f32.mrf.mxu1  ;;  %v2377_v27 = vadd.f32 %v461_v37, %v296_v55 }
 0x135   :  { %v2379_v38 = vpop.f32.mrf.mxu0 }
 0x138   :  { %1344 = vmatmul.msk.f32.gmra.mxu0 %vm113_vm15, %v1465_v39  ;;  %593 = vmatmul.f32.gmra.mxu2 %v2154_v46  ;;  %v410_v46 = vadd.f32 %v2260_v40, %v2279_v31  ;;  %v414_v40 = vadd.f32 %v2275_v59, %v2296_v62  ;;  %vm1272_vm15 = vcmask 7168  }
 0x13a   :  { %v633_v52 = vpop.f32.mrf.mxu3 }
 0x13b   :  { %v304_v4 = vpop.f32.mrf.mxu2 }
 0x13c   :  { %v893_v21 = vpop.f32.mrf.mxu1  ;;  %v2386_v5 = vadd.f32 %v465_v6, %v304_v4  ;;  %v1152_v6 = vpop.permute.xlu1 %1151 }
 0x13d   :  { %v792_v57 = vpop.f32.mrf.mxu0  ;;  %vm1194_vm2 = vcmp.eq.s32.totalorder %v1867_v26, %v1152_v6 }
 0x142   :  { %v639_v8 = vpop.f32.mrf.mxu3 }
 0x143   :  { %v519_v14 = vpop.f32.mrf.mxu2 }
 0x144   :  { %v897_v16 = vpop.f32.mrf.mxu1  ;;  %v520_v23 = vadd.f32 %v519_v14, %v406_v10  ;;  %v1155_v10 = vpop.permute.xlu0 %1154 }
 0x145   :  { %v796_v36 = vpop.f32.mrf.mxu0  ;;  %vm1195_vm3 = vcmp.eq.s32.totalorder %v1867_v26, %v1155_v10 }
 0x146   :  { %v634_v44 = vadd.f32 %v633_v52, %v520_v23 }
 0x148   :  { %v793_v41 = vadd.f32 %v792_v57, %v634_v44 }
 0x14a   :  { %v645_v39 = vpop.f32.mrf.mxu3  ;;  %v2392_v20 = vadd.f32 %v889_v13, %v793_v41 }
 0x14b   :  { %v524_v34 = vpop.f32.mrf.mxu2 }
 0x14c   :  { %v901_v28 = vpop.f32.mrf.mxu1  ;;  %952 = vst [vmem:[%s2754_s3] sm:$0xff] %v2392_v20  ;;  %v525_v56 = vadd.f32 %v524_v34, %v410_v46  ;;  %968 = vmax.xlane.f32.xlu1 %v2392_v20  ;;  %v1208_v3 = vsel %vm1192_vm0, %v2392_v20, 0.0  ;;  %v1158_v46 = vpop.permute.xlu2 %1157 }
 0x14d   :  { %v800_v1 = vpop.f32.mrf.mxu0  ;;  %1224 = vadd.xlane.f32.xlu2 %v1208_v3  ;;  %v1161_v34 = vpop.permute.xlu1 %1160  ;;  %vm1196_vm4 = vcmp.eq.s32.totalorder %v1867_v26, %v1158_v46 }
 0x14e   :  { %v640_v12 = vadd.f32 %v639_v8, %v525_v56  ;;  %v430_v56 = vadd.f32 %v2343_v43, %v2364_v2  ;;  %vm1197_vm5 = vcmp.eq.s32.totalorder %v1867_v26, %v1161_v34  ;;  %v1164_v2 = vpop.permute.xlu0 %1163 }
 0x14f   :  { %vm1198_vm6 = vcmp.eq.s32.totalorder %v1867_v26, %v1164_v2 }
 0x150   :  { %v797_v25 = vadd.f32 %v796_v36, %v640_v12 }
 0x152   :  { %v651_v33 = vpop.f32.mrf.mxu3  ;;  %v2403_v48 = vadd.f32 %v893_v21, %v797_v25 }
 0x153   :  { %v529_v50 = vpop.f32.mrf.mxu2 }
 0x154   :  { %v905_v54 = vpop.f32.mrf.mxu1  ;;  %953 = vst [vmem:[%s2754_s3 + $0x8] sm:$0xff] %v2403_v48  ;;  %v530_v31 = vadd.f32 %v529_v50, %v414_v40  ;;  %v1209_v42 = vsel %vm1193_vm1, %v2403_v48, 0.0 }
 0x155   :  { %v804_v30 = vpop.f32.mrf.mxu0  ;;  %1226 = vadd.xlane.f32.xlu1 %v1209_v42  ;;  %970 = vmax.xlane.f32.xlu2 %v2403_v48 }
 0x156   :  { %v646_v60 = vadd.f32 %v645_v39, %v530_v31 }
 0x158   :  { %v801_v59 = vadd.f32 %v800_v1, %v646_v60 }
 0x15a   :  { %v657_v62 = vpop.f32.mrf.mxu3  ;;  %v2414_v61 = vadd.f32 %v897_v16, %v801_v59 }
 0x15b   :  { %v534_v19 = vpop.f32.mrf.mxu2 }
 0x15c   :  { %954 = vst [vmem:[%s2754_s3 + $0x10] sm:$0xff] %v2414_v61  ;;  %v535_v49 = vadd.f32 %v534_v19, %v418_v11  ;;  %972 = vmax.xlane.f32.xlu0 %v2414_v61  ;;  %v909_v37 = vpop.f32.mrf.mxu1  ;;  %v1210_v4 = vsel %vm1194_vm2, %v2414_v61, 0.0 }
 0x15d   :  { %v808_v0 = vpop.f32.mrf.mxu0 }
 0x15e   :  { %v652_v32 = vadd.f32 %v651_v33, %v535_v49 }
 0x160   :  { %v805_v55 = vadd.f32 %v804_v30, %v652_v32 }
 0x162   :  { %v663_v13 = vpop.f32.mrf.mxu3  ;;  %v2424_v7 = vadd.f32 %v901_v28, %v805_v55  ;;  %v1167_v55 = vpop.permute.xlu2 %1166 }
 0x163   :  { %v539_v52 = vpop.f32.mrf.mxu2  ;;  %vm1199_vm7 = vcmp.eq.s32.totalorder %v1867_v26, %v1167_v55 }
 0x164   :  { %955 = vst [vmem:[%s2754_s3 + $0x18] sm:$0xff] %v2424_v7  ;;  %v540_v21 = vadd.f32 %v539_v52, %v422_v17  ;;  %974 = vmax.xlane.f32.xlu2 %v2424_v7  ;;  %1228 = vadd.xlane.f32.xlu0 %v1210_v4  ;;  %v913_v14 = vpop.f32.mrf.mxu1  ;;  %v1211_v44 = vsel %vm1195_vm3, %v2424_v7, 0.0 }
 0x165   :  { %v812_v57 = vpop.f32.mrf.mxu0 }
 0x166   :  { %v658_v8 = vadd.f32 %v657_v62, %v540_v21 }
 0x168   :  { %v809_v16 = vadd.f32 %v808_v0, %v658_v8 }
 0x16a   :  { %v669_v53 = vpop.f32.mrf.mxu3  ;;  %v2435_v23 = vadd.f32 %v905_v54, %v809_v16  ;;  %v434_v54 = vadd.f32 %v2360_v29, %v2379_v38 }
 0x16b   :  { %v544_v36 = vpop.f32.mrf.mxu2 }
 0x16c   :  { %956 = vst [vmem:[%s2754_s3 + $0x20] sm:$0xff] %v2435_v23  ;;  %v545_v47 = vadd.f32 %v544_v36, %v426_v22  ;;  %976 = vmax.xlane.f32.xlu1 %v2435_v23  ;;  %1230 = vadd.xlane.f32.xlu2 %v1211_v44  ;;  %v917_v9 = vpop.f32.mrf.mxu1  ;;  %v1212_v12 = vsel %vm1196_vm4, %v2435_v23, 0.0 }
 0x16d   :  { %v816_v41 = vpop.f32.mrf.mxu0 }
 0x16e   :  { %v664_v39 = vadd.f32 %v663_v13, %v545_v47 }
 0x170   :  { %v813_v28 = vadd.f32 %v812_v57, %v664_v39 }
 0x172   :  { %v675_v51 = vpop.f32.mrf.mxu3  ;;  %v2446_v1 = vadd.f32 %v909_v37, %v813_v28 }
 0x173   :  { %v549_v3 = vpop.f32.mrf.mxu2 }
 0x174   :  { %957 = vst [vmem:[%s2754_s3 + $0x28] sm:$0xff] %v2446_v1  ;;  %v550_v24 = vadd.f32 %v549_v3, %v430_v56  ;;  %1232 = vadd.xlane.f32.xlu1 %v1212_v12  ;;  %978 = vmax.xlane.f32.xlu2 %v2446_v1  ;;  %v1213_v33 = vsel %vm1197_vm5, %v2446_v1, 0.0  ;;  %v921_v30 = vpop.f32.mrf.mxu1  ;;  %v2501_v56 = vpop.permute.xlu1 %1169 }
 0x175   :  { %v820_v25 = vpop.f32.mrf.mxu0  ;;  %1234 = vadd.xlane.f32.xlu0 %v1213_v33  ;;  %vm1200_vm9 = vcmp.eq.s32.totalorder %v1867_v26, %v2501_v56 }
 0x176   :  { %v670_v43 = vadd.f32 %v669_v53, %v550_v24 }
 0x178   :  { %v817_v40 = vadd.f32 %v816_v41, %v670_v43 }
 0x17a   :  { %v681_v50 = vpop.f32.mrf.mxu3  ;;  %v2458_v31 = vadd.f32 %v913_v14, %v817_v40 }
 0x17b   :  { %v554_v42 = vpop.f32.mrf.mxu2 }
 0x17c   :  { %958 = vst [vmem:[%s2754_s3 + $0x30] sm:$0xff] %v2458_v31  ;;  %v555_v60 = vadd.f32 %v554_v42, %v434_v54  ;;  %v1214_v62 = vsel %vm1198_vm6, %v2458_v31, 0.0  ;;  %v925_v32 = vpop.f32.mrf.mxu1  ;;  %v2521_v42 = vpop.permute.xlu2 %1175 }
 0x17d   :  { %v824_v59 = vpop.f32.mrf.mxu0  ;;  %1236 = vadd.xlane.f32.xlu2 %v1214_v62  ;;  %980 = vmax.xlane.f32.xlu0 %v2458_v31  ;;  %v1173_v62 = vpop.permute.xlu0 %1172  ;;  %vm1202_vm13 = vcmp.eq.s32.totalorder %v1867_v26, %v2521_v42 }
 0x17e   :  { %v676_v11 = vadd.f32 %v675_v51, %v555_v60  ;;  %vm1201_vm8 = vcmp.eq.s32.totalorder %v1867_v26, %v1173_v62 }
 0x180   :  { %v821_v29 = vadd.f32 %v820_v25, %v676_v11 }
 0x182   :  { %v687_v38 = vpop.f32.mrf.mxu3  ;;  %v2467_v19 = vadd.f32 %v917_v9, %v821_v29 }
 0x183   :  { %v559_v49 = vpop.f32.mrf.mxu2 }
 0x184   :  { %959 = vst [vmem:[%s2754_s3 + $0x38] sm:$0xff] %v2467_v19  ;;  %v560_v0 = vadd.f32 %v559_v49, %v2277_v18  ;;  %982 = vmax.xlane.f32.xlu1 %v2467_v19  ;;  %v1215_v21 = vsel %vm1199_vm7, %v2467_v19, 0.0  ;;  %v929_v10 = vpop.f32.mrf.mxu1 }
 0x185   :  { %v828_v37 = vpop.f32.mrf.mxu0 }
 0x186   :  { %v682_v6 = vadd.f32 %v681_v50, %v560_v0 }
 0x188   :  { %v825_v13 = vadd.f32 %v824_v59, %v682_v6  ;;  %v2533_v6 = vpop.permute.xlu2 %1184 }
 0x189   :  { %vm1205_vm0 = vcmp.eq.s32.totalorder %v1867_v26, %v2533_v6 }
 0x18a   :  { %v2476_v17 = vadd.f32 %v921_v30, %v825_v13  ;;  %v693_v52 = vpop.f32.mrf.mxu3  ;;  %v2519_v30 = vpop.permute.xlu1 %1178 }
 0x18b   :  { %v564_v4 = vpop.f32.mrf.mxu2  ;;  %vm1203_vm11 = vcmp.eq.s32.totalorder %v1867_v26, %v2519_v30 }
 0x18c   :  { %960 = vst [vmem:[%s2754_s3 + $0x40] sm:$0xff] %v2476_v17  ;;  %v565_v18 = vadd.f32 %v564_v4, %v2294_v58  ;;  %1238 = vadd.xlane.f32.xlu1 %v1215_v21  ;;  %984 = vmax.xlane.f32.xlu2 %v2476_v17  ;;  %v933_v41 = vpop.f32.mrf.mxu1  ;;  %v2543_v4 = vpop.permute.xlu0 %1181 }
 0x18d   :  { %v832_v57 = vpop.f32.mrf.mxu0  ;;  %vm1204_vm10 = vcmp.eq.s32.totalorder %v1867_v26, %v2543_v4 }
 0x18e   :  { %v688_v8 = vadd.f32 %v687_v38, %v565_v18 }
 0x190   :  { %v829_v14 = vadd.f32 %v828_v37, %v688_v8 }
 0x192   :  { %v2485_v16 = vadd.f32 %v925_v32, %v829_v14  ;;  %v699_v58 = vpop.f32.mrf.mxu3  ;;  %v2531_v37 = vpop.permute.xlu1 %1187 }
 0x193   :  { %v569_v53 = vpop.f32.mrf.mxu2  ;;  %vm1206_vm14 = vcmp.eq.s32.totalorder %v1867_v26, %v2531_v37 }
 0x194   :  { %961 = vst [vmem:[%s2754_s3 + $0x48] sm:$0xff] %v2485_v16  ;;  %v570_v22 = vadd.f32 %v569_v53, %v2311_v63  ;;  %986 = vmax.xlane.f32.xlu0 %v2485_v16  ;;  %v937_v12 = vpop.f32.mrf.mxu1 }
 0x195   :  { %v836_v44 = vpop.f32.mrf.mxu0 }
 0x196   :  { %v694_v36 = vadd.f32 %v693_v52, %v570_v22 }
 0x198   :  { %v833_v47 = vadd.f32 %v832_v57, %v694_v36  ;;  %v1217_v36 = vsel %vm1201_vm8, %v2485_v16, 0.0 }
 0x19a   :  { %v2493_v39 = vadd.f32 %v929_v10, %v833_v47  ;;  %v705_v28 = vpop.f32.mrf.mxu3 }
 0x19b   :  { %v574_v46 = vpop.f32.mrf.mxu2 }
 0x19c   :  { %962 = vst [vmem:[%s2754_s3 + $0x50] sm:$0xff] %v2493_v39  ;;  %v575_v34 = vadd.f32 %v574_v46, %v2328_v15  ;;  %988 = vmax.xlane.f32.xlu1 %v2493_v39 }
 0x19d   :  { %v840_v51 = vpop.f32.mrf.mxu0 }
 0x19e   :  { %v700_v63 = vadd.f32 %v699_v58, %v575_v34  ;;  %v1216_v34 = vsel %vm1200_vm9, %v2476_v17, 0.0 }
 0x1a0   :  { %v837_v9 = vadd.f32 %v836_v44, %v700_v63 }
 0x1a2   :  { %v2503_v3 = vadd.f32 %v933_v41, %v837_v9  ;;  %v711_v43 = vpop.f32.mrf.mxu3 }
 0x1a3   :  { %v579_v24 = vpop.f32.mrf.mxu2 }
 0x1a4   :  { %963 = vst [vmem:[%s2754_s3 + $0x58] sm:$0xff] %v2503_v3  ;;  %v580_v25 = vadd.f32 %v579_v24, %v2345_v45  ;;  %990 = vmax.xlane.f32.xlu2 %v2503_v3  ;;  %v941_v45 = vpop.f32.mrf.mxu1  ;;  %v1219_v4 = vsel %vm1203_vm11, %v2503_v3, 0.0 }
 0x1a5   :  { %v844_v40 = vpop.f32.mrf.mxu0 }
 0x1a6   :  { %v706_v15 = vadd.f32 %v705_v28, %v580_v25 }
 0x1a8   :  { %v841_v33 = vadd.f32 %v840_v51, %v706_v15 }
 0x1aa   :  { %v2511_v2 = vadd.f32 %v937_v12, %v841_v33  ;;  %v717_v29 = vpop.f32.mrf.mxu3 }
 0x1ab   :  { %v584_v50 = vpop.f32.mrf.mxu2 }
 0x1ac   :  { %964 = vst [vmem:[%s2754_s3 + $0x60] sm:$0xff] %v2511_v2  ;;  %v585_v54 = vadd.f32 %v584_v50, %v2362_v35  ;;  %992 = vmax.xlane.f32.xlu0 %v2511_v2  ;;  %v945_v32 = vpop.f32.mrf.mxu1 }
 0x1ad   :  { %v848_v49 = vpop.f32.mrf.mxu0 }
 0x1ae   :  { %v712_v60 = vadd.f32 %v711_v43, %v585_v54 }
 0x1b0   :  { %v845_v59 = vadd.f32 %v844_v40, %v712_v60 }
 0x1b2   :  { %v2523_v11 = vadd.f32 %v941_v45, %v845_v59  ;;  %v723_v21 = vpop.f32.mrf.mxu3 }
 0x1b3   :  { %v589_v38 = vpop.f32.mrf.mxu2 }
 0x1b4   :  { %965 = vst [vmem:[%s2754_s3 + $0x68] sm:$0xff] %v2523_v11  ;;  %v590_v35 = vadd.f32 %v589_v38, %v2377_v27  ;;  %994 = vmax.xlane.f32.xlu1 %v2523_v11  ;;  %v949_v22 = vpop.f32.mrf.mxu1 }
 0x1b5   :  { %v852_v57 = vpop.f32.mrf.mxu0 }
 0x1b6   :  { %v718_v0 = vadd.f32 %v717_v29, %v590_v35 }
 0x1b8   :  { %v849_v55 = vadd.f32 %v848_v49, %v718_v0 }
 0x1ba   :  { %v2535_v13 = vadd.f32 %v945_v32, %v849_v55 }
 0x1bb   :  { %v594_v52 = vpop.f32.mrf.mxu2 }
 0x1bc   :  { %966 = vst [vmem:[%s2754_s3 + $0x70] sm:$0xff] %v2535_v13  ;;  %v595_v27 = vadd.f32 %v594_v52, %v2386_v5  ;;  %996 = vmax.xlane.f32.xlu2 %v2535_v13  ;;  %v1222_v30 = vsel %vm1206_vm14, %v2535_v13, 0.0 }
 0x1be   :  { %v724_v18 = vadd.f32 %v723_v21, %v595_v27 }
 0x1bf   :  { %v2545_v8 = vpop.xlane.xlu1 %968 }
 0x1c0   :  { %v853_v10 = vadd.f32 %v852_v57, %v724_v18  ;;  %v1000_v14 = vsub.f32 %v2392_v20, %v2545_v8  ;;  %v2549_v53 = vpop.xlane.xlu2 %1224  ;;  %v2560_v20 = vpop.permute.xlu0 %1190 }
 0x1c1   :  { %vm1207_vm12 = vcmp.eq.s32.totalorder %v1867_v26, %v2560_v20 }
 0x1c2   :  { %v2552_v58 = vadd.f32 %v949_v22, %v853_v10  ;;  %v1016_v5 = vmul.f32 1.442695, %v1000_v14 }
 0x1c4   :  { %967 = vst [vmem:[%s2754_s3 + $0x78] sm:$0xff] %v2552_v58  ;;  %1399 = vpow2.f32 %v1016_v5  ;;  %1242 = vadd.xlane.f32.xlu2 %v1217_v36  ;;  %998 = vmax.xlane.f32.xlu0 %v2552_v58 }
 0x1c8   :  { %v2562_v44 = vpop.xlane.xlu2 %970 }
 0x1c9   :  { %v1001_v47 = vsub.f32 %v2403_v48, %v2562_v44  ;;  %v2573_v48 = vpop.xlane.xlu1 %1226 }
 0x1ca   :  { %v1400_v41 = vpop.eup %1399 }
 0x1cb   :  { %v1018_v46 = vmul.f32 1.442695, %v1001_v47  ;;  %1048 = vadd.xlane.f32.xlu1 %v1400_v41 }
 0x1cc   :  { %1240 = vadd.xlane.f32.xlu0 %v1216_v34 }
 0x1cd   :  { %1401 = vpow2.f32 %v1018_v46 }
 0x1cf   :  { %v2569_v63 = vpop.xlane.xlu0 %972 }
 0x1d0   :  { %v1002_v28 = vsub.f32 %v2414_v61, %v2569_v63 }
 0x1d2   :  { %v1020_v9 = vmul.f32 1.442695, %v1002_v28 }
 0x1d3   :  { %v1402_v51 = vpop.eup %1401 }
 0x1d4   :  { %1403 = vpow2.f32 %v1020_v9  ;;  %1050 = vadd.xlane.f32.xlu2 %v1402_v51 }
 0x1d7   :  { %v2575_v12 = vpop.xlane.xlu2 %974  ;;  %v2583_v61 = vpop.xlane.xlu0 %1228 }
 0x1d8   :  { %v1003_v56 = vsub.f32 %v2424_v7, %v2575_v12 }
 0x1da   :  { %v1404_v24 = vpop.eup %1403  ;;  %v1022_v25 = vmul.f32 1.442695, %v1003_v56 }
 0x1db   :  { %1052 = vadd.xlane.f32.xlu0 %v1404_v24 }
 0x1dc   :  { %1405 = vpow2.f32 %v1022_v25 }
 0x1df   :  { %v2579_v15 = vpop.xlane.xlu2 %1230  ;;  %v2581_v33 = vpop.xlane.xlu1 %976 }
 0x1e0   :  { %v1004_v43 = vsub.f32 %v2435_v23, %v2581_v33 }
 0x1e2   :  { %v1406_v40 = vpop.eup %1405  ;;  %v1024_v50 = vmul.f32 1.442695, %v1004_v43 }
 0x1e3   :  { %1054 = vadd.xlane.f32.xlu1 %v1406_v40 }
 0x1e4   :  { %1407 = vpow2.f32 %v1024_v50 }
 0x1e7   :  { %v2587_v54 = vpop.xlane.xlu2 %978  ;;  %v2593_v62 = vpop.xlane.xlu1 %1232 }
 0x1e8   :  { %v1005_v7 = vsub.f32 %v2446_v1, %v2587_v54  ;;  %v2591_v45 = vpop.xlane.xlu0 %1234 }
 0x1ea   :  { %v1408_v60 = vpop.eup %1407  ;;  %v1026_v59 = vmul.f32 1.442695, %v1005_v7 }
 0x1eb   :  { %1056 = vadd.xlane.f32.xlu2 %v1408_v60 }
 0x1ec   :  { %1409 = vpow2.f32 %v1026_v59 }
 0x1f0   :  { %v2595_v29 = vpop.xlane.xlu0 %980  ;;  %v2599_v49 = vpop.xlane.xlu2 %1236 }
 0x1f1   :  { %v1006_v23 = vsub.f32 %v2458_v31, %v2595_v29 }
 0x1f2   :  { %v1410_v38 = vpop.eup %1409 }
 0x1f3   :  { %v1028_v35 = vmul.f32 1.442695, %v1006_v23  ;;  %1058 = vadd.xlane.f32.xlu0 %v1410_v38 }
 0x1f5   :  { %1411 = vpow2.f32 %v1028_v35 }
 0x1f7   :  { %v2601_v1 = vpop.xlane.xlu1 %982 }
 0x1f8   :  { %v1007_v0 = vsub.f32 %v2467_v19, %v2601_v1 }
 0x1fa   :  { %v1030_v32 = vmul.f32 1.442695, %v1007_v0  ;;  %v1220_v0 = vsel %vm1204_vm10, %v2511_v2, 0.0 }
 0x1fb   :  { %v1412_v55 = vpop.eup %1411 }
 0x1fc   :  { %1413 = vpow2.f32 %v1030_v32  ;;  %1060 = vadd.xlane.f32.xlu1 %v1412_v55 }
 0x1ff   :  { %v2605_v52 = vpop.xlane.xlu2 %984  ;;  %v2609_v18 = vpop.xlane.xlu1 %1238 }
 0x200   :  { %v1008_v31 = vsub.f32 %v2476_v17, %v2605_v52 }
 0x202   :  { %v1414_v27 = vpop.eup %1413  ;;  %v1032_v21 = vmul.f32 1.442695, %v1008_v31 }
 0x203   :  { %1062 = vadd.xlane.f32.xlu2 %v1414_v27 }
 0x204   :  { %1415 = vpow2.f32 %v1032_v21 }
 0x207   :  { %v2611_v57 = vpop.xlane.xlu0 %986 }
 0x208   :  { %v1009_v19 = vsub.f32 %v2485_v16, %v2611_v57 }
 0x20a   :  { %v1416_v10 = vpop.eup %1415  ;;  %v1034_v14 = vmul.f32 1.442695, %v1009_v19 }
 0x20b   :  { %1064 = vadd.xlane.f32.xlu0 %v1416_v10 }
 0x20c   :  { %1417 = vpow2.f32 %v1034_v14 }
 0x20f   :  { %v2615_v22 = vpop.xlane.xlu1 %988 }
 0x210   :  { %v1010_v17 = vsub.f32 %v2493_v39, %v2615_v22 }
 0x212   :  { %v1418_v5 = vpop.eup %1417  ;;  %v1036_v36 = vmul.f32 1.442695, %v1010_v17 }
 0x213   :  { %1066 = vadd.xlane.f32.xlu1 %v1418_v5 }
 0x214   :  { %1419 = vpow2.f32 %v1036_v36 }
 0x217   :  { %v2619_v47 = vpop.xlane.xlu2 %990 }
 0x218   :  { %v1011_v41 = vsub.f32 %v2503_v3, %v2619_v47 }
 0x21a   :  { %v1420_v46 = vpop.eup %1419  ;;  %v1038_v16 = vmul.f32 1.442695, %v1011_v41 }
 0x21b   :  { %1068 = vadd.xlane.f32.xlu2 %v1420_v46 }
 0x21c   :  { %1421 = vpow2.f32 %v1038_v16 }
 0x21f   :  { %v2623_v34 = vpop.xlane.xlu0 %992 }
 0x220   :  { %v1012_v28 = vsub.f32 %v2511_v2, %v2623_v34  ;;  %v1223_v2 = vsel %vm1207_vm12, %v2552_v58, 0.0 }
 0x222   :  { %v1422_v9 = vpop.eup %1421  ;;  %v1040_v51 = vmul.f32 1.442695, %v1012_v28 }
 0x223   :  { %1070 = vadd.xlane.f32.xlu0 %v1422_v9 }
 0x224   :  { %1423 = vpow2.f32 %v1040_v51 }
 0x227   :  { %v2627_v56 = vpop.xlane.xlu1 %994 }
 0x228   :  { %v1013_v24 = vsub.f32 %v2523_v11, %v2627_v56 }
 0x22a   :  { %v1424_v25 = vpop.eup %1423  ;;  %v1042_v43 = vmul.f32 1.442695, %v1013_v24 }
 0x22b   :  { %1072 = vadd.xlane.f32.xlu1 %v1424_v25 }
 0x22c   :  { %1425 = vpow2.f32 %v1042_v43 }
 0x22f   :  { %v2631_v40 = vpop.xlane.xlu2 %996 }
 0x230   :  { %v1014_v50 = vsub.f32 %v2535_v13, %v2631_v40  ;;  %v1221_v13 = vsel %vm1205_vm0, %v2523_v11, 0.0 }
 0x232   :  { %v1426_v7 = vpop.eup %1425  ;;  %v1044_v60 = vmul.f32 1.442695, %v1014_v50 }
 0x233   :  { %1074 = vadd.xlane.f32.xlu2 %v1426_v7 }
 0x234   :  { %1427 = vpow2.f32 %v1044_v60 }
 0x237   :  { %v2635_v59 = vpop.xlane.xlu0 %998  ;;  %v2642_v55 = vpop.xlane.xlu2 %1242 }
 0x238   :  { %v1015_v23 = vsub.f32 %v2552_v58, %v2635_v59  ;;  %v1218_v58 = vsel %vm1202_vm13, %v2493_v39, 0.0 }
 0x23a   :  { %v1428_v38 = vpop.eup %1427  ;;  %v1046_v35 = vmul.f32 1.442695, %v1015_v23 }
 0x23b   :  { %1076 = vadd.xlane.f32.xlu0 %v1428_v38  ;;  %1248 = vadd.xlane.f32.xlu2 %v1220_v0 }
 0x23c   :  { %1429 = vpow2.f32 %v1046_v35 }
 0x23e   :  { %v1049_v32 = vpop.xlane.xlu1 %1048 }
 0x23f   :  { %1431 = vlog2.f32 %v1049_v32  ;;  %v2650_v19 = vpop.xlane.xlu0 %1240 }
 0x242   :  { %v1430_v31 = vpop.eup %1429 }
 0x243   :  { %1246 = vadd.xlane.f32.xlu0 %v1219_v4  ;;  %1078 = vadd.xlane.f32.xlu1 %v1430_v31 }
 0x244   :  { %1254 = vadd.xlane.f32.xlu2 %v1223_v2 }
 0x245   :  { %v1432_v27 = vpop.eup %1431 }
 0x246   :  { %v1081_v21 = vmul.f32 0.6931472, %v1432_v27 }
 0x247   :  { %v1051_v10 = vpop.xlane.xlu2 %1050 }
 0x248   :  { %v1112_v14 = vadd.f32 %v1081_v21, %v2545_v8  ;;  %1433 = vlog2.f32 %v1051_v10 }
 0x24a   :  { %v1256_v3 = vsub.f32 %v1112_v14, %v2549_v53 }
 0x24b   :  { %1252 = vadd.xlane.f32.xlu0 %v1222_v30  ;;  %1244 = vadd.xlane.f32.xlu1 %v1218_v58 }
 0x24c   :  { %1273 = vst.msk [vmem:[%s2755_s4] sm:$0xff] %vm1272_vm15, %v1256_v3 }
 0x24e   :  { %v1434_v8 = vpop.eup %1433  ;;  %v1053_v20 = vpop.xlane.xlu0 %1052 }
 0x24f   :  { %v1083_v42 = vmul.f32 0.6931472, %v1434_v8  ;;  %1435 = vlog2.f32 %v1053_v20 }
 0x251   :  { %v1113_v37 = vadd.f32 %v1083_v42, %v2562_v44 }
 0x253   :  { %v1257_v39 = vsub.f32 %v1113_v37, %v2573_v48  ;;  %1250 = vadd.xlane.f32.xlu1 %v1221_v13 }
 0x255   :  { %v1436_v53 = vpop.eup %1435  ;;  %1274 = vst.msk [vmem:[%s2755_s4 + $0x8] sm:$0xff] %vm1272_vm15, %v1257_v39 }
 0x256   :  { %v1085_v17 = vmul.f32 0.6931472, %v1436_v53  ;;  %v1055_v5 = vpop.xlane.xlu1 %1054 }
 0x257   :  { %1437 = vlog2.f32 %v1055_v5 }
 0x258   :  { %v1114_v36 = vadd.f32 %v1085_v17, %v2569_v63 }
 0x25a   :  { %v1258_v26 = vsub.f32 %v1114_v36, %v2583_v61 }
 0x25c   :  { %1275 = vst.msk [vmem:[%s2755_s4 + $0x10] sm:$0xff] %vm1272_vm15, %v1258_v26 }
 0x25d   :  { %v1438_v11 = vpop.eup %1437 }
 0x25e   :  { %v1087_v6 = vmul.f32 0.6931472, %v1438_v11  ;;  %v1057_v44 = vpop.xlane.xlu2 %1056 }
 0x25f   :  { %1439 = vlog2.f32 %v1057_v44 }
 0x260   :  { %v1115_v48 = vadd.f32 %v1087_v6, %v2575_v12 }
 0x262   :  { %v1259_v41 = vsub.f32 %v1115_v48, %v2579_v15 }
 0x264   :  { %1276 = vst.msk [vmem:[%s2755_s4 + $0x18] sm:$0xff] %vm1272_vm15, %v1259_v41 }
 0x265   :  { %v1440_v63 = vpop.eup %1439 }
 0x266   :  { %v1089_v61 = vmul.f32 0.6931472, %v1440_v63  ;;  %v1059_v46 = vpop.xlane.xlu0 %1058 }
 0x267   :  { %1441 = vlog2.f32 %v1059_v46 }
 0x268   :  { %v1116_v16 = vadd.f32 %v1089_v61, %v2581_v33 }
 0x26a   :  { %v1260_v28 = vsub.f32 %v1116_v16, %v2593_v62 }
 0x26c   :  { %1277 = vst.msk [vmem:[%s2755_s4 + $0x20] sm:$0xff] %vm1272_vm15, %v1260_v28 }
 0x26d   :  { %v1442_v12 = vpop.eup %1441 }
 0x26e   :  { %v1091_v15 = vmul.f32 0.6931472, %v1442_v12 }
 0x26f   :  { %v1061_v9 = vpop.xlane.xlu1 %1060 }
 0x270   :  { %v1117_v51 = vadd.f32 %v1091_v15, %v2587_v54  ;;  %1443 = vlog2.f32 %v1061_v9 }
 0x272   :  { %v1261_v24 = vsub.f32 %v1117_v51, %v2591_v45 }
 0x274   :  { %1278 = vst.msk [vmem:[%s2755_s4 + $0x28] sm:$0xff] %vm1272_vm15, %v1261_v24 }
 0x276   :  { %v1444_v33 = vpop.eup %1443  ;;  %v1063_v62 = vpop.xlane.xlu2 %1062 }
 0x277   :  { %v1093_v25 = vmul.f32 0.6931472, %v1444_v33  ;;  %1445 = vlog2.f32 %v1063_v62 }
 0x279   :  { %v1118_v43 = vadd.f32 %v1093_v25, %v2595_v29 }
 0x27b   :  { %v1262_v50 = vsub.f32 %v1118_v43, %v2599_v49 }
 0x27d   :  { %v1446_v7 = vpop.eup %1445  ;;  %1279 = vst.msk [vmem:[%s2755_s4 + $0x30] sm:$0xff] %vm1272_vm15, %v1262_v50 }
 0x27e   :  { %v1095_v54 = vmul.f32 0.6931472, %v1446_v7  ;;  %v1065_v45 = vpop.xlane.xlu0 %1064 }
 0x27f   :  { %1447 = vlog2.f32 %v1065_v45 }
 0x280   :  { %v1119_v60 = vadd.f32 %v1095_v54, %v2601_v1 }
 0x282   :  { %v1263_v23 = vsub.f32 %v1119_v60, %v2609_v18 }
 0x284   :  { %1280 = vst.msk [vmem:[%s2755_s4 + $0x38] sm:$0xff] %vm1272_vm15, %v1263_v23 }
 0x285   :  { %v1448_v29 = vpop.eup %1447 }
 0x286   :  { %v1097_v49 = vmul.f32 0.6931472, %v1448_v29  ;;  %v1067_v38 = vpop.xlane.xlu1 %1066 }
 0x287   :  { %1449 = vlog2.f32 %v1067_v38 }
 0x288   :  { %v1120_v35 = vadd.f32 %v1097_v49, %v2605_v52 }
 0x28a   :  { %v1264_v0 = vsub.f32 %v1120_v35, %v2650_v19 }
 0x28c   :  { %1281 = vst.msk [vmem:[%s2755_s4 + $0x40] sm:$0xff] %vm1272_vm15, %v1264_v0 }
 0x28d   :  { %v1450_v1 = vpop.eup %1449 }
 0x28e   :  { %v1099_v18 = vmul.f32 0.6931472, %v1450_v1  ;;  %v1069_v4 = vpop.xlane.xlu2 %1068 }
 0x290   :  { %v1121_v32 = vadd.f32 %v1099_v18, %v2611_v57 }
 0x292   :  { %v1265_v31 = vsub.f32 %v1121_v32, %v2642_v55 }
 0x294   :  { %1282 = vst.msk [vmem:[%s2755_s4 + $0x48] sm:$0xff] %vm1272_vm15, %v1265_v31 }
 0x296   :  { %v1071_v2 = vpop.xlane.xlu0 %1070 }
 0x29e   :  { %v1073_v52 = vpop.xlane.xlu1 %1072 }
 0x29f   :  { %1451 = vlog2.f32 %v1073_v52 }
 0x2a0   :  { %1453 = vlog2.f32 %v1071_v2 }
 0x2a1   :  { %1455 = vlog2.f32 %v1069_v4 }
 0x2a5   :  { %v1452_v27 = vpop.eup %1451 }
 0x2a6   :  { %v1075_v21 = vpop.xlane.xlu2 %1074  ;;  %v1105_v19 = vmul.f32 0.6931472, %v1452_v27  ;;  %v1454_v14 = vpop.eup %1453 }
 0x2a7   :  { %v1103_v30 = vmul.f32 0.6931472, %v1454_v14  ;;  %v1456_v58 = vpop.eup %1455 }
 0x2a8   :  { %v1124_v10 = vadd.f32 %v1105_v19, %v2623_v34  ;;  %v1101_v34 = vmul.f32 0.6931472, %v1456_v58 }
 0x2a9   :  { %v1123_v8 = vadd.f32 %v1103_v30, %v2619_v47 }
 0x2aa   :  { %v1122_v5 = vadd.f32 %v1101_v34, %v2615_v22 }
 0x2ae   :  { %v1077_v3 = vpop.xlane.xlu0 %1076  ;;  %v1249_v57 = vpop.xlane.xlu2 %1248 }
 0x2af   :  { %v1268_v55 = vsub.f32 %v1124_v10, %v1249_v57  ;;  %1457 = vlog2.f32 %v1077_v3 }
 0x2b1   :  { %1285 = vst.msk [vmem:[%s2755_s4 + $0x60] sm:$0xff] %vm1272_vm15, %v1268_v55 }
 0x2b5   :  { %v1458_v20 = vpop.eup %1457 }
 0x2b6   :  { %v1247_v42 = vpop.xlane.xlu0 %1246  ;;  %v1079_v37 = vpop.xlane.xlu1 %1078  ;;  %v1109_v39 = vmul.f32 0.6931472, %v1458_v20 }
 0x2b7   :  { %v1267_v13 = vsub.f32 %v1123_v8, %v1247_v42  ;;  %1459 = vlog2.f32 %v1079_v37  ;;  %v1255_v63 = vpop.xlane.xlu2 %1254 }
 0x2b8   :  { %1461 = vlog2.f32 %v1075_v21  ;;  %v1126_v17 = vadd.f32 %v1109_v39, %v2631_v40 }
 0x2b9   :  { %1284 = vst.msk [vmem:[%s2755_s4 + $0x58] sm:$0xff] %vm1272_vm15, %v1267_v13 }
 0x2bd   :  { %v1460_v53 = vpop.eup %1459 }
 0x2be   :  { %v1462_v36 = vpop.eup %1461  ;;  %v1111_v47 = vmul.f32 0.6931472, %v1460_v53  ;;  %v1253_v26 = vpop.xlane.xlu0 %1252 }
 0x2bf   :  { %v1245_v11 = vpop.xlane.xlu1 %1244  ;;  %v1270_v6 = vsub.f32 %v1126_v17, %v1253_v26  ;;  %v1107_v41 = vmul.f32 0.6931472, %v1462_v36 }
 0x2c0   :  { %v1266_v44 = vsub.f32 %v1122_v5, %v1245_v11  ;;  %v1127_v48 = vadd.f32 %v1111_v47, %v2635_v59 }
 0x2c1   :  { %1287 = vst.msk [vmem:[%s2755_s4 + $0x70] sm:$0xff] %vm1272_vm15, %v1270_v6  ;;  %v1125_v22 = vadd.f32 %v1107_v41, %v2627_v56 }
 0x2c2   :  { %v1271_v61 = vsub.f32 %v1127_v48, %v1255_v63  ;;  %1283 = vst.msk [vmem:[%s2755_s4 + $0x50] sm:$0xff] %vm1272_vm15, %v1266_v44 }
 0x2c4   :  { %1288 = vst.msk [vmem:[%s2755_s4 + $0x78] sm:$0xff] %vm1272_vm15, %v1271_v61 }
 0x2c7   :  { %v1251_v40 = vpop.xlane.xlu1 %1250 }
 0x2c8   :  { %v1269_v59 = vsub.f32 %v1125_v22, %v1251_v40 }
 0x2ca   :  { %1286 = vst.msk [vmem:[%s2755_s4 + $0x68] sm:$0xff] %vm1272_vm15, %v1269_v59 }

</bundles_post_ra>
